<compile_context>
chip_gen: v7x
topology: tpu7x:2x2x1
jax: 0.10.0
libtpu: 0.0.40
codegen_flags: <defaults>
</compile_context>

<pallas_src>
import functools

import jax
import jax.numpy as jnp
import numpy as np
from jax.experimental import pallas as pl
from jax.experimental.pallas import tpu as pltpu


def _round_up(x, m):
    return ((x + m - 1) // m) * m


def mf2lstm_kernel(x_ref, wih_ref, whh_ref, b_ref, wfc_ref, bfc_ref, out_ref,
                   h_sc, c_sc, xg_sc, hy_sc,
                   *, n_outputs, t_chunk, b_tile, n_hidden_p):
    T, Bt, Hp = t_chunk, b_tile, n_hidden_p
    mm_dtype = wih_ref.dtype          # bf16 or f32 matmul operands (weights decide)

    # Initialize the carried hidden state at the first time chunk of each batch tile.
    @pl.when(pl.program_id(1) == 0)
    def _():
        h_sc[...] = jnp.zeros_like(h_sc)
        c_sc[...] = jnp.zeros_like(c_sc)

    # ---- Hoisted, chunk-wide input projection (q / W_fq already folded in) ----
    x_flat = x_ref[...].reshape(T * Bt, x_ref.shape[-1]).astype(mm_dtype)
    xg = jnp.dot(x_flat, wih_ref[...],
                 preferred_element_type=jnp.float32) + b_ref[...]     # (T*Bt, 4Hp)
    xg_sc[...] = xg.reshape(T, Bt, 4 * Hp)

    # ---- Sequential recurrence over the time chunk (h, c carried in vregs) ----
    def step(t, carry):
        h, c = carry
        gates = xg_sc[t] + jnp.dot(h.astype(mm_dtype), whh_ref[...],
                                   preferred_element_type=jnp.float32)
        # Hp is a multiple of 128 -> each gate slice is a full 128-lane block.
        i_a = jax.nn.sigmoid(gates[:, 0:Hp])
        f_a = jax.nn.sigmoid(gates[:, Hp:2 * Hp])
        g_a = jnp.tanh(gates[:, 2 * Hp:3 * Hp])
        o_a = jax.nn.sigmoid(gates[:, 3 * Hp:4 * Hp])
        c_new = f_a * c + i_a * g_a
        h_new = o_a * jnp.tanh(c_new)
        hy_sc[t] = h_new
        return (h_new, c_new)

    unroll = 8 if Bt <= 16 else 2     # large tiles: keep vreg pressure in check
    h_fin, c_fin = jax.lax.fori_loop(0, T, step, (h_sc[...], c_sc[...]),
                                     unroll=min(T, unroll))
    h_sc[...] = h_fin
    c_sc[...] = c_fin

    # ---- fc + activation over the whole chunk ----
    if n_outputs == 1:
        # VPU broadcast-mul + lane reduction (no N=1 MXU matmul), lane-dense store.
        w = wfc_ref[...].reshape(1, 1, Hp)
        logits = jnp.sum(hy_sc[...] * w, axis=-1) + bfc_ref[...]       # (T, Bt)
        out_ref[...] = jax.nn.sigmoid(logits).T                        # (Bt, T)
    else:
        hy_flat = hy_sc[...].reshape(T * Bt, Hp)
        logits = jnp.dot(hy_flat, wfc_ref[...],
                         preferred_element_type=jnp.float32) + bfc_ref[...]
        out_ref[...] = jax.nn.softmax(logits, axis=-1).reshape(T, Bt, n_outputs)


def _select_tiles(S, B, Hp, f_aug, n_outputs, *, scratch_budget=24 << 20):
    """Pick (T, S_pad, b_tile, Bp) so chunk scratch + stream buffers fit the budget."""
    Bp = _round_up(B, 8)
    # Lane-dense output blocks need T to be the full seq or a multiple of 128.
    T = S if S <= 128 else 128
    S_pad = _round_up(S, T)
    f_lanes = _round_up(f_aug, 128)
    o_lanes = 1 if n_outputs == 1 else _round_up(n_outputs, 128)
    per_row = (T * 5 * Hp * 4            # xg_sc + hy_sc scratch
               + 2 * Hp * 4              # h, c carries
               + 2 * T * f_lanes * 4     # x chunk, double buffered
               + 2 * T * o_lanes * 4)    # output block, double buffered
    bt = max(8, min(128, (scratch_budget // per_row) // 8 * 8))
    if Bp >= 16:                         # keep >=2 batch tiles for v7x megacore
        bt = min(bt, max(8, (Bp // 2) // 8 * 8))
    bt = min(bt, Bp)
    Bp = _round_up(Bp, bt)
    return T, S_pad, bt, Bp


def _estimate_vmem_bytes(T, bt, Hp, f_aug, n_outputs, w_bytes):
    f_lanes = _round_up(f_aug, 128)
    btp = _round_up(bt, 8)
    o_lanes = _round_up(n_outputs, 128)
    scratch = (T * bt * 5 * Hp + 2 * bt * Hp) * 4
    x_buf = 2 * T * btp * f_lanes * 4
    out_buf = 2 * btp * _round_up(T, 128) * 4 if n_outputs == 1 \
        else 2 * T * btp * o_lanes * 4
    weights = 2 * (_round_up(f_aug, 8) * 4 * Hp + Hp * 4 * Hp) * w_bytes
    weights += 2 * (8 * 4 * Hp + Hp * o_lanes + 8 * o_lanes) * 4
    return scratch + x_buf + out_buf + weights


def mf2lstm_forward(x, params, *, n_hidden, n_outputs, delta_ts_col,
                    elapsed_time='small', no_small_delta=True, use_bf16=False):
    """x: (batch, seq, n_inputs + 1) float32. Returns (seq*batch, n_outputs)."""
    x = x.astype(jnp.float32)
    B, S, _ = x.shape
    H, O = n_hidden, n_outputs
    Hp = _round_up(H, 128)

    # Split the elapsed-time column off the features (matches the PyTorch forward).
    delta_ts = x[:, :, delta_ts_col]                                     # (B, S)
    x_feat = jnp.concatenate([x[:, :, :delta_ts_col],
                              x[:, :, delta_ts_col + 1:]], axis=2)       # (B, S, F)
    F = x_feat.shape[2]

    # Precompute time-decay features and CONCATENATE them onto the features, so the
    # whole per-step projection is a single matmul (W_fq is folded into W_ih below).
    d = jnp.maximum(delta_ts, 1.0) if no_small_delta else delta_ts
    g = 1.0 / d if elapsed_time == 'small' else 1.0 / jnp.log(jnp.e * d)
    q = jnp.stack([g / 60.0, (g / 720.0) ** 2, (g / 1440.0) ** 3], axis=-1)  # (B,S,3)
    x_aug = jnp.concatenate([x_feat, q], axis=2)                         # (B, S, F+3)
    F_aug = F + 3

    T, S_pad, b_tile, Bp = _select_tiles(S, B, Hp, F_aug, O)
    nb, nt = Bp // b_tile, S_pad // T

    # Time-major + zero padding (padded rows/steps are inert; outputs sliced off).
    x_tm = jnp.pad(jnp.transpose(x_aug, (1, 0, 2)),
                   ((0, S_pad - S), (0, Bp - B), (0, 0)))                # (S_pad,Bp,F+3)

    # ---- Parameter preparation ----------------------------------------------------
    # Gate-wise padding so each gate occupies its own Hp-wide block; W_fq^T spliced
    # into the f-gate columns of the augmented input projection, b_fq into its bias.
    wih4 = params['weight_ih'].reshape(4, H, F)
    wih4 = jnp.pad(wih4, ((0, 0), (0, Hp - H), (0, 0)))                  # (4, Hp, F)
    wfq_p = jnp.pad(params['weight_fq'], ((0, Hp - H), (0, 0)))          # (Hp, 3)
    extra = jnp.zeros((4, Hp, 3), jnp.float32).at[1].set(wfq_p)          # f-gate only
    w_aug = jnp.concatenate([wih4, extra], axis=2).reshape(4 * Hp, F_aug)

    whh4 = params['weight_hh'].reshape(4, H, H)
    whh4 = jnp.pad(whh4, ((0, 0), (0, Hp - H), (0, Hp - H)))             # (4, Hp, Hp)
    whh_p = whh4.reshape(4 * Hp, Hp)

    b4 = (params['bias_ih'] + params['bias_hh']).reshape(4, H)
    b4 = b4.at[1].add(params['bias_fq'])                                 # fold b_fq
    bias2 = jnp.pad(b4, ((0, 0), (0, Hp - H))).reshape(1, 4 * Hp)

    w_dtype = jnp.bfloat16 if use_bf16 else jnp.float32
    wih_t = w_aug.T.astype(w_dtype)                                      # (F+3, 4Hp)
    whh_t = whh_p.T.astype(w_dtype)                                      # (Hp, 4Hp)

    wfc_p = jnp.pad(params['fc_weight'], ((0, 0), (0, Hp - H)))          # (O, Hp)
    if O == 1:
        wfc_in = wfc_p                                                   # (1, Hp)
        bfc_in = params['fc_bias'].reshape(1, 1)
        wfc_spec = pl.BlockSpec((1, Hp), lambda b, t: (0, 0))
        bfc_spec = pl.BlockSpec((1, 1), lambda b, t: (0, 0))
        out_shape = jax.ShapeDtypeStruct((Bp, S_pad), jnp.float32)       # lane-dense
        out_spec = pl.BlockSpec((b_tile, T), lambda b, t: (b, t))
    else:
        wfc_in = wfc_p.T                                                 # (Hp, O)
        bfc_in = params['fc_bias'].reshape(1, O)
        wfc_spec = pl.BlockSpec((Hp, O), lambda b, t: (0, 0))
        bfc_spec = pl.BlockSpec((1, O), lambda b, t: (0, 0))
        out_shape = jax.ShapeDtypeStruct((S_pad, Bp, O), jnp.float32)
        out_spec = pl.BlockSpec((T, b_tile, O), lambda b, t: (t, b, 0))

    est = _estimate_vmem_bytes(T, b_tile, Hp, F_aug, O, 2 if use_bf16 else 4)
    vmem_limit = int(min(56 << 20, max(32 << 20, est * 1.5)))

    kernel = functools.partial(mf2lstm_kernel, n_outputs=O, t_chunk=T,
                               b_tile=b_tile, n_hidden_p=Hp)

    out = pl.pallas_call(
        kernel,
        out_shape=out_shape,
        grid_spec=pltpu.PrefetchScalarGridSpec(
            num_scalar_prefetch=0,
            grid=(nb, nt),                                # (batch tiles, time chunks)
            in_specs=[
                pl.BlockSpec((T, b_tile, F_aug), lambda b, t: (t, b, 0)),  # x (+q)
                pl.BlockSpec((F_aug, 4 * Hp), lambda b, t: (0, 0)),        # [Wih|Wfq]^T
                pl.BlockSpec((Hp, 4 * Hp), lambda b, t: (0, 0)),           # W_hh^T
                pl.BlockSpec((1, 4 * Hp), lambda b, t: (0, 0)),            # fused bias
                wfc_spec,                                                  # fc weight
                bfc_spec,                                                  # fc bias
            ],
            out_specs=out_spec,
            scratch_shapes=[
                pltpu.VMEM((b_tile, Hp), jnp.float32),           # h (carried)
                pltpu.VMEM((b_tile, Hp), jnp.float32),           # c (carried)
                pltpu.VMEM((T, b_tile, 4 * Hp), jnp.float32),    # x@W^T + bias
                pltpu.VMEM((T, b_tile, Hp), jnp.float32),        # hy chunk
            ],
        ),
        compiler_params=pltpu.CompilerParams(
            dimension_semantics=("parallel", "arbitrary"),
            vmem_limit_bytes=vmem_limit),
    )(x_tm, wih_t, whh_t, bias2, wfc_in, bfc_in)

    if O == 1:
        out = out[:B, :S]                     # (B, S), lane-dense layout
        return out.T.reshape(S * B, 1)        # PyTorch flattening: row = s*B + b
    out = out[:S, :B, :]
    return out.reshape(S * B, O)


def mf2lstm_reference(x, params, *, n_hidden, n_outputs, delta_ts_col,
                      elapsed_time='small', no_small_delta=True):
    """Pure-JAX reference mirroring the PyTorch forward."""
    x = x.astype(jnp.float32)
    B, S, _ = x.shape
    delta_ts = x[:, :, delta_ts_col]
    x_feat = jnp.concatenate([x[:, :, :delta_ts_col],
                              x[:, :, delta_ts_col + 1:]], axis=2)
    x_tm = jnp.transpose(x_feat, (1, 0, 2))          # (S, B, F)
    dt_tm = jnp.transpose(delta_ts, (1, 0))          # (S, B)

    Wih, Whh, Wfq = params['weight_ih'], params['weight_hh'], params['weight_fq']
    bih, bhh, bfq = params['bias_ih'], params['bias_hh'], params['bias_fq']
    Wfc, bfc = params['fc_weight'], params['fc_bias']
    H = n_hidden

    def step(carry, inp):
        hx, cx = carry
        x_t, d_t = inp
        gates = x_t @ Wih.T + bih + hx @ Whh.T + bhh
        i_g, f_g, g_g, o_g = gates[:, :H], gates[:, H:2*H], gates[:, 2*H:3*H], gates[:, 3*H:]
        d = jnp.maximum(d_t, 1.0) if no_small_delta else d_t
        g = 1.0 / d if elapsed_time == 'small' else 1.0 / jnp.log(jnp.e * d)
        g = g.reshape(B, 1)
        q = jnp.concatenate([g / 60.0, (g / 720.0) ** 2, (g / 1440.0) ** 3], axis=1)
        f_g = f_g + q @ Wfq.T + bfq
        i_a, f_a = jax.nn.sigmoid(i_g), jax.nn.sigmoid(f_g)
        g_a, o_a = jnp.tanh(g_g), jax.nn.sigmoid(o_g)
        cy = f_a * cx + i_a * g_a
        hy = o_a * jnp.tanh(cy)
        return (hy, cy), hy

    h0 = jnp.zeros((B, H), jnp.float32)
    c0 = jnp.zeros((B, H), jnp.float32)
    _, hs = jax.lax.scan(step, (h0, c0), (x_tm, dt_tm))     # (S, B, H)
    flat = hs.reshape(S * B, H)
    logits = flat @ Wfc.T + bfc
    if n_outputs == 1:
        return jax.nn.sigmoid(logits)
    return jax.nn.softmax(logits, axis=-1)


def init_params(key, n_inputs, n_hidden, n_outputs):
    ks = jax.random.split(key, 8)
    s = 0.1
    return {
        'weight_ih': s * jax.random.normal(ks[0], (4 * n_hidden, n_inputs), jnp.float32),
        'weight_hh': s * jax.random.normal(ks[1], (4 * n_hidden, n_hidden), jnp.float32),
        'weight_fq': s * jax.random.normal(ks[2], (n_hidden, 3), jnp.float32),
        'bias_ih': s * jax.random.normal(ks[3], (4 * n_hidden,), jnp.float32),
        'bias_hh': s * jax.random.normal(ks[4], (4 * n_hidden,), jnp.float32),
        'bias_fq': s * jax.random.normal(ks[5], (n_hidden,), jnp.float32),
        'fc_weight': s * jax.random.normal(ks[6], (n_outputs, n_hidden), jnp.float32),
        'fc_bias': s * jax.random.normal(ks[7], (n_outputs,), jnp.float32),
    }


if __name__ == "__main__":
    n_inputs, n_hidden = 6, 32
    batch, seq = 4, 8
    delta_ts_col = n_inputs  # default when embed_features is None

    key = jax.random.PRNGKey(0)
    k_x, k_dt, k_p1, k_p3 = jax.random.split(key, 4)

    # x has n_inputs feature columns plus the delta_ts column appended last
    feats = jax.random.normal(k_x, (batch, seq, n_inputs), jnp.float32)
    deltas = jax.random.uniform(k_dt, (batch, seq, 1), jnp.float32, 0.5, 10.0)
    x = jnp.concatenate([feats, deltas], axis=2)       # (batch, seq, n_inputs + 1)

    # ---- n_outputs = 1 (sigmoid head), f32 matmuls ----
    params1 = init_params(k_p1, n_inputs, n_hidden, 1)
    out = jax.block_until_ready(
        mf2lstm_forward(x, params1, n_hidden=n_hidden, n_outputs=1,
                        delta_ts_col=delta_ts_col, use_bf16=False))
    ref = jax.block_until_ready(
        mf2lstm_reference(x, params1, n_hidden=n_hidden, n_outputs=1,
                          delta_ts_col=delta_ts_col))
    assert out.shape == (seq * batch, 1), out.shape
    np.testing.assert_allclose(np.asarray(out), np.asarray(ref), rtol=1e-4, atol=2e-5)

    # ---- n_outputs = 1, bf16 matmul operands (v6e/v7x MXU path) ----
    out_bf = jax.block_until_ready(
        mf2lstm_forward(x, params1, n_hidden=n_hidden, n_outputs=1,
                        delta_ts_col=delta_ts_col, use_bf16=True))
    np.testing.assert_allclose(np.asarray(out_bf), np.asarray(ref),
                               rtol=2e-2, atol=2e-3)

    # ---- n_outputs = 3 (softmax head), f32 matmuls ----
    params3 = init_params(k_p3, n_inputs, n_hidden, 3)
    out3 = jax.block_until_ready(
        mf2lstm_forward(x, params3, n_hidden=n_hidden, n_outputs=3,
                        delta_ts_col=delta_ts_col, use_bf16=False))
    ref3 = jax.block_until_ready(
        mf2lstm_reference(x, params3, n_hidden=n_hidden, n_outputs=3,
                          delta_ts_col=delta_ts_col))
    assert out3.shape == (seq * batch, 3), out3.shape
    np.testing.assert_allclose(np.asarray(out3), np.asarray(ref3), rtol=1e-4, atol=3e-5)

    print("KERNEL_OK")
</pallas_src>

<mosaic_0001>
module attributes {stable_mosaic.version = 11 : i64} {
  func.func @mf2lstm_kernel(%arg0: i32, %arg1: i32, %arg2: memref<8x8x9xf32, #tpu.memory_space<vmem>>, %arg3: memref<9x512xf32, #tpu.memory_space<vmem>>, %arg4: memref<128x512xf32, #tpu.memory_space<vmem>>, %arg5: memref<1x512xf32, #tpu.memory_space<vmem>>, %arg6: memref<1x128xf32, #tpu.memory_space<vmem>>, %arg7: memref<1x1xf32, #tpu.memory_space<vmem>>, %arg8: memref<8x8xf32, #tpu.memory_space<vmem>>, %arg9: memref<8x128xf32, #tpu.memory_space<vmem>>, %arg10: memref<8x128xf32, #tpu.memory_space<vmem>>, %arg11: memref<8x8x512xf32, #tpu.memory_space<vmem>>, %arg12: memref<8x8x128xf32, #tpu.memory_space<vmem>>) attributes {dimension_semantics = [#tpu.dimension_semantics<parallel>, #tpu.dimension_semantics<arbitrary>], iteration_bounds = array<i64: 1, 1>, scalar_prefetch = 0 : i64, scratch_operands = 4 : i64, tpu.core_type = #tpu.core_type<tc>, window_params = [{transform_indices = @transform_0, window_bounds = array<i64: 8, 8, 9>}, {pipeline_mode = #tpu.pipeline_mode<synchronous>, transform_indices = @transform_1, window_bounds = array<i64: 9, 512>}, {pipeline_mode = #tpu.pipeline_mode<synchronous>, transform_indices = @transform_2, window_bounds = array<i64: 128, 512>}, {pipeline_mode = #tpu.pipeline_mode<synchronous>, transform_indices = @transform_3, window_bounds = array<i64: 1, 512>}, {pipeline_mode = #tpu.pipeline_mode<synchronous>, transform_indices = @transform_4, window_bounds = array<i64: 1, 128>}, {pipeline_mode = #tpu.pipeline_mode<synchronous>, transform_indices = @transform_5, window_bounds = array<i64: 1, 1>}, {transform_indices = @transform_6, window_bounds = array<i64: 8, 8>}]} {
    %c0_i32 = arith.constant 0 : i32
    %0 = arith.cmpi eq, %arg1, %c0_i32 : i32
    %1 = arith.extui %0 : i1 to i32
    %c0_i32_0 = arith.constant 0 : i32
    %2 = arith.cmpi ne, %1, %c0_i32_0 : i32
    scf.if %2 {
      %cst_110 = arith.constant 0.000000e+00 : f32
      %312 = vector.broadcast %cst_110 : f32 to vector<8x128xf32>
      %c0_111 = arith.constant 0 : index
      %c0_112 = arith.constant 0 : index
      %313 = vector.load %arg9[%c0_111, %c0_112] : memref<8x128xf32, #tpu.memory_space<vmem>>, vector<8x128xf32>
      tpu.vector_store %arg9[%c0_111, %c0_112], %312 {strides = array<i32>} : memref<8x128xf32, #tpu.memory_space<vmem>>, vector<8x128xf32>,
      %cst_113 = arith.constant 0.000000e+00 : f32
      %314 = vector.broadcast %cst_113 : f32 to vector<8x128xf32>
      %c0_114 = arith.constant 0 : index
      %c0_115 = arith.constant 0 : index
      %315 = vector.load %arg10[%c0_114, %c0_115] : memref<8x128xf32, #tpu.memory_space<vmem>>, vector<8x128xf32>
      tpu.vector_store %arg10[%c0_114, %c0_115], %314 {strides = array<i32>} : memref<8x128xf32, #tpu.memory_space<vmem>>, vector<8x128xf32>,
    } else {
    }
    %c0 = arith.constant 0 : index
    %c0_1 = arith.constant 0 : index
    %c0_2 = arith.constant 0 : index
    %3 = vector.load %arg2[%c0, %c0_1, %c0_2] : memref<8x8x9xf32, #tpu.memory_space<vmem>>, vector<8x8x9xf32>
    %4 = vector.shape_cast %3 : vector<8x8x9xf32> to vector<64x9xf32>
    %c0_3 = arith.constant 0 : index
    %c0_4 = arith.constant 0 : index
    %5 = vector.load %arg3[%c0_3, %c0_4] : memref<9x512xf32, #tpu.memory_space<vmem>>, vector<9x512xf32>
    %cst = arith.constant dense<0.000000e+00> : vector<64x512xf32>
    %6 = tpu.matmul %4, %5, %cst {dimension_numbers = #tpu.dot_dimension_numbers<[1], [0], [0], [1], [0, 0, 1, 1], [], []>} : vector<64x9xf32>, vector<9x512xf32>, vector<64x512xf32> -> vector<64x512xf32>
    %c0_5 = arith.constant 0 : index
    %c0_6 = arith.constant 0 : index
    %7 = vector.load %arg5[%c0_5, %c0_6] : memref<1x512xf32, #tpu.memory_space<vmem>>, vector<1x512xf32>
    %8 = vector.broadcast %7 : vector<1x512xf32> to vector<64x512xf32>
    %9 = arith.addf %6, %8 : vector<64x512xf32>
    %10 = vector.shape_cast %9 : vector<64x512xf32> to vector<8x8x512xf32>
    %c0_7 = arith.constant 0 : index
    %c0_8 = arith.constant 0 : index
    %c0_9 = arith.constant 0 : index
    %11 = vector.load %arg11[%c0_7, %c0_8, %c0_9] : memref<8x8x512xf32, #tpu.memory_space<vmem>>, vector<8x8x512xf32>
    tpu.vector_store %arg11[%c0_7, %c0_8, %c0_9], %10 {strides = array<i32>} : memref<8x8x512xf32, #tpu.memory_space<vmem>>, vector<8x8x512xf32>,
    %c0_10 = arith.constant 0 : index
    %c0_11 = arith.constant 0 : index
    %12 = vector.load %arg9[%c0_10, %c0_11] : memref<8x128xf32, #tpu.memory_space<vmem>>, vector<8x128xf32>
    %c0_12 = arith.constant 0 : index
    %c0_13 = arith.constant 0 : index
    %13 = vector.load %arg10[%c0_12, %c0_13] : memref<8x128xf32, #tpu.memory_space<vmem>>, vector<8x128xf32>
    %c0_i32_14 = arith.constant 0 : i32
    %14 = arith.index_cast %c0_i32_14 : i32 to index
    %c0_15 = arith.constant 0 : index
    %c0_16 = arith.constant 0 : index
    %15 = vector.load %arg11[%14, %c0_15, %c0_16] : memref<8x8x512xf32, #tpu.memory_space<vmem>>, vector<1x8x512xf32>
    %16 = vector.shape_cast %15 : vector<1x8x512xf32> to vector<8x512xf32>
    %c0_17 = arith.constant 0 : index
    %c0_18 = arith.constant 0 : index
    %17 = vector.load %arg4[%c0_17, %c0_18] : memref<128x512xf32, #tpu.memory_space<vmem>>, vector<128x512xf32>
    %cst_19 = arith.constant dense<0.000000e+00> : vector<8x512xf32>
    %18 = tpu.matmul %12, %17, %cst_19 {dimension_numbers = #tpu.dot_dimension_numbers<[1], [0], [0], [1], [0, 0, 1, 1], [], []>} : vector<8x128xf32>, vector<128x512xf32>, vector<8x512xf32> -> vector<8x512xf32>
    %19 = arith.addf %16, %18 : vector<8x512xf32>
    %20 = vector.extract_strided_slice %19 {offsets = [0, 0], sizes = [8, 128], strides = [1, 1]} : vector<8x512xf32> to vector<8x128xf32>
    %21 = arith.negf %20 : vector<8x128xf32>
    %22 = math.exp %21 : vector<8x128xf32>
    %cst_20 = arith.constant 1.000000e+00 : f32
    %23 = vector.broadcast %cst_20 : f32 to vector<8x128xf32>
    %24 = arith.addf %23, %22 : vector<8x128xf32>
    %25 = arith.divf %23, %24 : vector<8x128xf32>
    %26 = vector.extract_strided_slice %19 {offsets = [0, 128], sizes = [8, 128], strides = [1, 1]} : vector<8x512xf32> to vector<8x128xf32>
    %27 = arith.negf %26 : vector<8x128xf32>
    %28 = math.exp %27 : vector<8x128xf32>
    %cst_21 = arith.constant 1.000000e+00 : f32
    %29 = vector.broadcast %cst_21 : f32 to vector<8x128xf32>
    %30 = arith.addf %29, %28 : vector<8x128xf32>
    %31 = arith.divf %29, %30 : vector<8x128xf32>
    %32 = vector.extract_strided_slice %19 {offsets = [0, 256], sizes = [8, 128], strides = [1, 1]} : vector<8x512xf32> to vector<8x128xf32>
    %33 = math.tanh %32 : vector<8x128xf32>
    %34 = vector.extract_strided_slice %19 {offsets = [0, 384], sizes = [8, 128], strides = [1, 1]} : vector<8x512xf32> to vector<8x128xf32>
    %35 = arith.negf %34 : vector<8x128xf32>
    %36 = math.exp %35 : vector<8x128xf32>
    %cst_22 = arith.constant 1.000000e+00 : f32
    %37 = vector.broadcast %cst_22 : f32 to vector<8x128xf32>
    %38 = arith.addf %37, %36 : vector<8x128xf32>
    %39 = arith.divf %37, %38 : vector<8x128xf32>
    %40 = arith.mulf %31, %13 : vector<8x128xf32>
    %41 = arith.mulf %25, %33 : vector<8x128xf32>
    %42 = arith.addf %40, %41 : vector<8x128xf32>
    %43 = math.tanh %42 : vector<8x128xf32>
    %44 = arith.mulf %39, %43 : vector<8x128xf32>
    %45 = arith.index_cast %c0_i32_14 : i32 to index
    %c0_23 = arith.constant 0 : index
    %c0_24 = arith.constant 0 : index
    %46 = vector.load %arg12[%45, %c0_23, %c0_24] : memref<8x8x128xf32, #tpu.memory_space<vmem>>, vector<1x8x128xf32>
    %47 = vector.shape_cast %46 : vector<1x8x128xf32> to vector<8x128xf32>
    %48 = vector.shape_cast %44 : vector<8x128xf32> to vector<1x8x128xf32>
    tpu.vector_store %arg12[%45, %c0_23, %c0_24], %48 {strides = array<i32>} : memref<8x8x128xf32, #tpu.memory_space<vmem>>, vector<1x8x128xf32>,
    %c1_i32 = arith.constant 1 : i32
    %49 = arith.index_cast %c1_i32 : i32 to index
    %c0_25 = arith.constant 0 : index
    %c0_26 = arith.constant 0 : index
    %50 = vector.load %arg11[%49, %c0_25, %c0_26] : memref<8x8x512xf32, #tpu.memory_space<vmem>>, vector<1x8x512xf32>
    %51 = vector.shape_cast %50 : vector<1x8x512xf32> to vector<8x512xf32>
    %c0_27 = arith.constant 0 : index
    %c0_28 = arith.constant 0 : index
    %52 = vector.load %arg4[%c0_27, %c0_28] : memref<128x512xf32, #tpu.memory_space<vmem>>, vector<128x512xf32>
    %cst_29 = arith.constant dense<0.000000e+00> : vector<8x512xf32>
    %53 = tpu.matmul %44, %52, %cst_29 {dimension_numbers = #tpu.dot_dimension_numbers<[1], [0], [0], [1], [0, 0, 1, 1], [], []>} : vector<8x128xf32>, vector<128x512xf32>, vector<8x512xf32> -> vector<8x512xf32>
    %54 = arith.addf %51, %53 : vector<8x512xf32>
    %55 = vector.extract_strided_slice %54 {offsets = [0, 0], sizes = [8, 128], strides = [1, 1]} : vector<8x512xf32> to vector<8x128xf32>
    %56 = arith.negf %55 : vector<8x128xf32>
    %57 = math.exp %56 : vector<8x128xf32>
    %cst_30 = arith.constant 1.000000e+00 : f32
    %58 = vector.broadcast %cst_30 : f32 to vector<8x128xf32>
    %59 = arith.addf %58, %57 : vector<8x128xf32>
    %60 = arith.divf %58, %59 : vector<8x128xf32>
    %61 = vector.extract_strided_slice %54 {offsets = [0, 128], sizes = [8, 128], strides = [1, 1]} : vector<8x512xf32> to vector<8x128xf32>
    %62 = arith.negf %61 : vector<8x128xf32>
    %63 = math.exp %62 : vector<8x128xf32>
    %cst_31 = arith.constant 1.000000e+00 : f32
    %64 = vector.broadcast %cst_31 : f32 to vector<8x128xf32>
    %65 = arith.addf %64, %63 : vector<8x128xf32>
    %66 = arith.divf %64, %65 : vector<8x128xf32>
    %67 = vector.extract_strided_slice %54 {offsets = [0, 256], sizes = [8, 128], strides = [1, 1]} : vector<8x512xf32> to vector<8x128xf32>
    %68 = math.tanh %67 : vector<8x128xf32>
    %69 = vector.extract_strided_slice %54 {offsets = [0, 384], sizes = [8, 128], strides = [1, 1]} : vector<8x512xf32> to vector<8x128xf32>
    %70 = arith.negf %69 : vector<8x128xf32>
    %71 = math.exp %70 : vector<8x128xf32>
    %cst_32 = arith.constant 1.000000e+00 : f32
    %72 = vector.broadcast %cst_32 : f32 to vector<8x128xf32>
    %73 = arith.addf %72, %71 : vector<8x128xf32>
    %74 = arith.divf %72, %73 : vector<8x128xf32>
    %75 = arith.mulf %66, %42 : vector<8x128xf32>
    %76 = arith.mulf %60, %68 : vector<8x128xf32>
    %77 = arith.addf %75, %76 : vector<8x128xf32>
    %78 = math.tanh %77 : vector<8x128xf32>
    %79 = arith.mulf %74, %78 : vector<8x128xf32>
    %80 = arith.index_cast %c1_i32 : i32 to index
    %c0_33 = arith.constant 0 : index
    %c0_34 = arith.constant 0 : index
    %81 = vector.load %arg12[%80, %c0_33, %c0_34] : memref<8x8x128xf32, #tpu.memory_space<vmem>>, vector<1x8x128xf32>
    %82 = vector.shape_cast %81 : vector<1x8x128xf32> to vector<8x128xf32>
    %83 = vector.shape_cast %79 : vector<8x128xf32> to vector<1x8x128xf32>
    tpu.vector_store %arg12[%80, %c0_33, %c0_34], %83 {strides = array<i32>} : memref<8x8x128xf32, #tpu.memory_space<vmem>>, vector<1x8x128xf32>,
    %c2_i32 = arith.constant 2 : i32
    %84 = arith.index_cast %c2_i32 : i32 to index
    %c0_35 = arith.constant 0 : index
    %c0_36 = arith.constant 0 : index
    %85 = vector.load %arg11[%84, %c0_35, %c0_36] : memref<8x8x512xf32, #tpu.memory_space<vmem>>, vector<1x8x512xf32>
    %86 = vector.shape_cast %85 : vector<1x8x512xf32> to vector<8x512xf32>
    %c0_37 = arith.constant 0 : index
    %c0_38 = arith.constant 0 : index
    %87 = vector.load %arg4[%c0_37, %c0_38] : memref<128x512xf32, #tpu.memory_space<vmem>>, vector<128x512xf32>
    %cst_39 = arith.constant dense<0.000000e+00> : vector<8x512xf32>
    %88 = tpu.matmul %79, %87, %cst_39 {dimension_numbers = #tpu.dot_dimension_numbers<[1], [0], [0], [1], [0, 0, 1, 1], [], []>} : vector<8x128xf32>, vector<128x512xf32>, vector<8x512xf32> -> vector<8x512xf32>
    %89 = arith.addf %86, %88 : vector<8x512xf32>
    %90 = vector.extract_strided_slice %89 {offsets = [0, 0], sizes = [8, 128], strides = [1, 1]} : vector<8x512xf32> to vector<8x128xf32>
    %91 = arith.negf %90 : vector<8x128xf32>
    %92 = math.exp %91 : vector<8x128xf32>
    %cst_40 = arith.constant 1.000000e+00 : f32
    %93 = vector.broadcast %cst_40 : f32 to vector<8x128xf32>
    %94 = arith.addf %93, %92 : vector<8x128xf32>
    %95 = arith.divf %93, %94 : vector<8x128xf32>
    %96 = vector.extract_strided_slice %89 {offsets = [0, 128], sizes = [8, 128], strides = [1, 1]} : vector<8x512xf32> to vector<8x128xf32>
    %97 = arith.negf %96 : vector<8x128xf32>
    %98 = math.exp %97 : vector<8x128xf32>
    %cst_41 = arith.constant 1.000000e+00 : f32
    %99 = vector.broadcast %cst_41 : f32 to vector<8x128xf32>
    %100 = arith.addf %99, %98 : vector<8x128xf32>
    %101 = arith.divf %99, %100 : vector<8x128xf32>
    %102 = vector.extract_strided_slice %89 {offsets = [0, 256], sizes = [8, 128], strides = [1, 1]} : vector<8x512xf32> to vector<8x128xf32>
    %103 = math.tanh %102 : vector<8x128xf32>
    %104 = vector.extract_strided_slice %89 {offsets = [0, 384], sizes = [8, 128], strides = [1, 1]} : vector<8x512xf32> to vector<8x128xf32>
    %105 = arith.negf %104 : vector<8x128xf32>
    %106 = math.exp %105 : vector<8x128xf32>
    %cst_42 = arith.constant 1.000000e+00 : f32
    %107 = vector.broadcast %cst_42 : f32 to vector<8x128xf32>
    %108 = arith.addf %107, %106 : vector<8x128xf32>
    %109 = arith.divf %107, %108 : vector<8x128xf32>
    %110 = arith.mulf %101, %77 : vector<8x128xf32>
    %111 = arith.mulf %95, %103 : vector<8x128xf32>
    %112 = arith.addf %110, %111 : vector<8x128xf32>
    %113 = math.tanh %112 : vector<8x128xf32>
    %114 = arith.mulf %109, %113 : vector<8x128xf32>
    %115 = arith.index_cast %c2_i32 : i32 to index
    %c0_43 = arith.constant 0 : index
    %c0_44 = arith.constant 0 : index
    %116 = vector.load %arg12[%115, %c0_43, %c0_44] : memref<8x8x128xf32, #tpu.memory_space<vmem>>, vector<1x8x128xf32>
    %117 = vector.shape_cast %116 : vector<1x8x128xf32> to vector<8x128xf32>
    %118 = vector.shape_cast %114 : vector<8x128xf32> to vector<1x8x128xf32>
    tpu.vector_store %arg12[%115, %c0_43, %c0_44], %118 {strides = array<i32>} : memref<8x8x128xf32, #tpu.memory_space<vmem>>, vector<1x8x128xf32>,
    %c3_i32 = arith.constant 3 : i32
    %119 = arith.index_cast %c3_i32 : i32 to index
    %c0_45 = arith.constant 0 : index
    %c0_46 = arith.constant 0 : index
    %120 = vector.load %arg11[%119, %c0_45, %c0_46] : memref<8x8x512xf32, #tpu.memory_space<vmem>>, vector<1x8x512xf32>
    %121 = vector.shape_cast %120 : vector<1x8x512xf32> to vector<8x512xf32>
    %c0_47 = arith.constant 0 : index
    %c0_48 = arith.constant 0 : index
    %122 = vector.load %arg4[%c0_47, %c0_48] : memref<128x512xf32, #tpu.memory_space<vmem>>, vector<128x512xf32>
    %cst_49 = arith.constant dense<0.000000e+00> : vector<8x512xf32>
    %123 = tpu.matmul %114, %122, %cst_49 {dimension_numbers = #tpu.dot_dimension_numbers<[1], [0], [0], [1], [0, 0, 1, 1], [], []>} : vector<8x128xf32>, vector<128x512xf32>, vector<8x512xf32> -> vector<8x512xf32>
    %124 = arith.addf %121, %123 : vector<8x512xf32>
    %125 = vector.extract_strided_slice %124 {offsets = [0, 0], sizes = [8, 128], strides = [1, 1]} : vector<8x512xf32> to vector<8x128xf32>
    %126 = arith.negf %125 : vector<8x128xf32>
    %127 = math.exp %126 : vector<8x128xf32>
    %cst_50 = arith.constant 1.000000e+00 : f32
    %128 = vector.broadcast %cst_50 : f32 to vector<8x128xf32>
    %129 = arith.addf %128, %127 : vector<8x128xf32>
    %130 = arith.divf %128, %129 : vector<8x128xf32>
    %131 = vector.extract_strided_slice %124 {offsets = [0, 128], sizes = [8, 128], strides = [1, 1]} : vector<8x512xf32> to vector<8x128xf32>
    %132 = arith.negf %131 : vector<8x128xf32>
    %133 = math.exp %132 : vector<8x128xf32>
    %cst_51 = arith.constant 1.000000e+00 : f32
    %134 = vector.broadcast %cst_51 : f32 to vector<8x128xf32>
    %135 = arith.addf %134, %133 : vector<8x128xf32>
    %136 = arith.divf %134, %135 : vector<8x128xf32>
    %137 = vector.extract_strided_slice %124 {offsets = [0, 256], sizes = [8, 128], strides = [1, 1]} : vector<8x512xf32> to vector<8x128xf32>
    %138 = math.tanh %137 : vector<8x128xf32>
    %139 = vector.extract_strided_slice %124 {offsets = [0, 384], sizes = [8, 128], strides = [1, 1]} : vector<8x512xf32> to vector<8x128xf32>
    %140 = arith.negf %139 : vector<8x128xf32>
    %141 = math.exp %140 : vector<8x128xf32>
    %cst_52 = arith.constant 1.000000e+00 : f32
    %142 = vector.broadcast %cst_52 : f32 to vector<8x128xf32>
    %143 = arith.addf %142, %141 : vector<8x128xf32>
    %144 = arith.divf %142, %143 : vector<8x128xf32>
    %145 = arith.mulf %136, %112 : vector<8x128xf32>
    %146 = arith.mulf %130, %138 : vector<8x128xf32>
    %147 = arith.addf %145, %146 : vector<8x128xf32>
    %148 = math.tanh %147 : vector<8x128xf32>
    %149 = arith.mulf %144, %148 : vector<8x128xf32>
    %150 = arith.index_cast %c3_i32 : i32 to index
    %c0_53 = arith.constant 0 : index
    %c0_54 = arith.constant 0 : index
    %151 = vector.load %arg12[%150, %c0_53, %c0_54] : memref<8x8x128xf32, #tpu.memory_space<vmem>>, vector<1x8x128xf32>
    %152 = vector.shape_cast %151 : vector<1x8x128xf32> to vector<8x128xf32>
    %153 = vector.shape_cast %149 : vector<8x128xf32> to vector<1x8x128xf32>
    tpu.vector_store %arg12[%150, %c0_53, %c0_54], %153 {strides = array<i32>} : memref<8x8x128xf32, #tpu.memory_space<vmem>>, vector<1x8x128xf32>,
    %c4_i32 = arith.constant 4 : i32
    %154 = arith.index_cast %c4_i32 : i32 to index
    %c0_55 = arith.constant 0 : index
    %c0_56 = arith.constant 0 : index
    %155 = vector.load %arg11[%154, %c0_55, %c0_56] : memref<8x8x512xf32, #tpu.memory_space<vmem>>, vector<1x8x512xf32>
    %156 = vector.shape_cast %155 : vector<1x8x512xf32> to vector<8x512xf32>
    %c0_57 = arith.constant 0 : index
    %c0_58 = arith.constant 0 : index
    %157 = vector.load %arg4[%c0_57, %c0_58] : memref<128x512xf32, #tpu.memory_space<vmem>>, vector<128x512xf32>
    %cst_59 = arith.constant dense<0.000000e+00> : vector<8x512xf32>
    %158 = tpu.matmul %149, %157, %cst_59 {dimension_numbers = #tpu.dot_dimension_numbers<[1], [0], [0], [1], [0, 0, 1, 1], [], []>} : vector<8x128xf32>, vector<128x512xf32>, vector<8x512xf32> -> vector<8x512xf32>
    %159 = arith.addf %156, %158 : vector<8x512xf32>
    %160 = vector.extract_strided_slice %159 {offsets = [0, 0], sizes = [8, 128], strides = [1, 1]} : vector<8x512xf32> to vector<8x128xf32>
    %161 = arith.negf %160 : vector<8x128xf32>
    %162 = math.exp %161 : vector<8x128xf32>
    %cst_60 = arith.constant 1.000000e+00 : f32
    %163 = vector.broadcast %cst_60 : f32 to vector<8x128xf32>
    %164 = arith.addf %163, %162 : vector<8x128xf32>
    %165 = arith.divf %163, %164 : vector<8x128xf32>
    %166 = vector.extract_strided_slice %159 {offsets = [0, 128], sizes = [8, 128], strides = [1, 1]} : vector<8x512xf32> to vector<8x128xf32>
    %167 = arith.negf %166 : vector<8x128xf32>
    %168 = math.exp %167 : vector<8x128xf32>
    %cst_61 = arith.constant 1.000000e+00 : f32
    %169 = vector.broadcast %cst_61 : f32 to vector<8x128xf32>
    %170 = arith.addf %169, %168 : vector<8x128xf32>
    %171 = arith.divf %169, %170 : vector<8x128xf32>
    %172 = vector.extract_strided_slice %159 {offsets = [0, 256], sizes = [8, 128], strides = [1, 1]} : vector<8x512xf32> to vector<8x128xf32>
    %173 = math.tanh %172 : vector<8x128xf32>
    %174 = vector.extract_strided_slice %159 {offsets = [0, 384], sizes = [8, 128], strides = [1, 1]} : vector<8x512xf32> to vector<8x128xf32>
    %175 = arith.negf %174 : vector<8x128xf32>
    %176 = math.exp %175 : vector<8x128xf32>
    %cst_62 = arith.constant 1.000000e+00 : f32
    %177 = vector.broadcast %cst_62 : f32 to vector<8x128xf32>
    %178 = arith.addf %177, %176 : vector<8x128xf32>
    %179 = arith.divf %177, %178 : vector<8x128xf32>
    %180 = arith.mulf %171, %147 : vector<8x128xf32>
    %181 = arith.mulf %165, %173 : vector<8x128xf32>
    %182 = arith.addf %180, %181 : vector<8x128xf32>
    %183 = math.tanh %182 : vector<8x128xf32>
    %184 = arith.mulf %179, %183 : vector<8x128xf32>
    %185 = arith.index_cast %c4_i32 : i32 to index
    %c0_63 = arith.constant 0 : index
    %c0_64 = arith.constant 0 : index
    %186 = vector.load %arg12[%185, %c0_63, %c0_64] : memref<8x8x128xf32, #tpu.memory_space<vmem>>, vector<1x8x128xf32>
    %187 = vector.shape_cast %186 : vector<1x8x128xf32> to vector<8x128xf32>
    %188 = vector.shape_cast %184 : vector<8x128xf32> to vector<1x8x128xf32>
    tpu.vector_store %arg12[%185, %c0_63, %c0_64], %188 {strides = array<i32>} : memref<8x8x128xf32, #tpu.memory_space<vmem>>, vector<1x8x128xf32>,
    %c5_i32 = arith.constant 5 : i32
    %189 = arith.index_cast %c5_i32 : i32 to index
    %c0_65 = arith.constant 0 : index
    %c0_66 = arith.constant 0 : index
    %190 = vector.load %arg11[%189, %c0_65, %c0_66] : memref<8x8x512xf32, #tpu.memory_space<vmem>>, vector<1x8x512xf32>
    %191 = vector.shape_cast %190 : vector<1x8x512xf32> to vector<8x512xf32>
    %c0_67 = arith.constant 0 : index
    %c0_68 = arith.constant 0 : index
    %192 = vector.load %arg4[%c0_67, %c0_68] : memref<128x512xf32, #tpu.memory_space<vmem>>, vector<128x512xf32>
    %cst_69 = arith.constant dense<0.000000e+00> : vector<8x512xf32>
    %193 = tpu.matmul %184, %192, %cst_69 {dimension_numbers = #tpu.dot_dimension_numbers<[1], [0], [0], [1], [0, 0, 1, 1], [], []>} : vector<8x128xf32>, vector<128x512xf32>, vector<8x512xf32> -> vector<8x512xf32>
    %194 = arith.addf %191, %193 : vector<8x512xf32>
    %195 = vector.extract_strided_slice %194 {offsets = [0, 0], sizes = [8, 128], strides = [1, 1]} : vector<8x512xf32> to vector<8x128xf32>
    %196 = arith.negf %195 : vector<8x128xf32>
    %197 = math.exp %196 : vector<8x128xf32>
    %cst_70 = arith.constant 1.000000e+00 : f32
    %198 = vector.broadcast %cst_70 : f32 to vector<8x128xf32>
    %199 = arith.addf %198, %197 : vector<8x128xf32>
    %200 = arith.divf %198, %199 : vector<8x128xf32>
    %201 = vector.extract_strided_slice %194 {offsets = [0, 128], sizes = [8, 128], strides = [1, 1]} : vector<8x512xf32> to vector<8x128xf32>
    %202 = arith.negf %201 : vector<8x128xf32>
    %203 = math.exp %202 : vector<8x128xf32>
    %cst_71 = arith.constant 1.000000e+00 : f32
    %204 = vector.broadcast %cst_71 : f32 to vector<8x128xf32>
    %205 = arith.addf %204, %203 : vector<8x128xf32>
    %206 = arith.divf %204, %205 : vector<8x128xf32>
    %207 = vector.extract_strided_slice %194 {offsets = [0, 256], sizes = [8, 128], strides = [1, 1]} : vector<8x512xf32> to vector<8x128xf32>
    %208 = math.tanh %207 : vector<8x128xf32>
    %209 = vector.extract_strided_slice %194 {offsets = [0, 384], sizes = [8, 128], strides = [1, 1]} : vector<8x512xf32> to vector<8x128xf32>
    %210 = arith.negf %209 : vector<8x128xf32>
    %211 = math.exp %210 : vector<8x128xf32>
    %cst_72 = arith.constant 1.000000e+00 : f32
    %212 = vector.broadcast %cst_72 : f32 to vector<8x128xf32>
    %213 = arith.addf %212, %211 : vector<8x128xf32>
    %214 = arith.divf %212, %213 : vector<8x128xf32>
    %215 = arith.mulf %206, %182 : vector<8x128xf32>
    %216 = arith.mulf %200, %208 : vector<8x128xf32>
    %217 = arith.addf %215, %216 : vector<8x128xf32>
    %218 = math.tanh %217 : vector<8x128xf32>
    %219 = arith.mulf %214, %218 : vector<8x128xf32>
    %220 = arith.index_cast %c5_i32 : i32 to index
    %c0_73 = arith.constant 0 : index
    %c0_74 = arith.constant 0 : index
    %221 = vector.load %arg12[%220, %c0_73, %c0_74] : memref<8x8x128xf32, #tpu.memory_space<vmem>>, vector<1x8x128xf32>
    %222 = vector.shape_cast %221 : vector<1x8x128xf32> to vector<8x128xf32>
    %223 = vector.shape_cast %219 : vector<8x128xf32> to vector<1x8x128xf32>
    tpu.vector_store %arg12[%220, %c0_73, %c0_74], %223 {strides = array<i32>} : memref<8x8x128xf32, #tpu.memory_space<vmem>>, vector<1x8x128xf32>,
    %c6_i32 = arith.constant 6 : i32
    %224 = arith.index_cast %c6_i32 : i32 to index
    %c0_75 = arith.constant 0 : index
    %c0_76 = arith.constant 0 : index
    %225 = vector.load %arg11[%224, %c0_75, %c0_76] : memref<8x8x512xf32, #tpu.memory_space<vmem>>, vector<1x8x512xf32>
    %226 = vector.shape_cast %225 : vector<1x8x512xf32> to vector<8x512xf32>
    %c0_77 = arith.constant 0 : index
    %c0_78 = arith.constant 0 : index
    %227 = vector.load %arg4[%c0_77, %c0_78] : memref<128x512xf32, #tpu.memory_space<vmem>>, vector<128x512xf32>
    %cst_79 = arith.constant dense<0.000000e+00> : vector<8x512xf32>
    %228 = tpu.matmul %219, %227, %cst_79 {dimension_numbers = #tpu.dot_dimension_numbers<[1], [0], [0], [1], [0, 0, 1, 1], [], []>} : vector<8x128xf32>, vector<128x512xf32>, vector<8x512xf32> -> vector<8x512xf32>
    %229 = arith.addf %226, %228 : vector<8x512xf32>
    %230 = vector.extract_strided_slice %229 {offsets = [0, 0], sizes = [8, 128], strides = [1, 1]} : vector<8x512xf32> to vector<8x128xf32>
    %231 = arith.negf %230 : vector<8x128xf32>
    %232 = math.exp %231 : vector<8x128xf32>
    %cst_80 = arith.constant 1.000000e+00 : f32
    %233 = vector.broadcast %cst_80 : f32 to vector<8x128xf32>
    %234 = arith.addf %233, %232 : vector<8x128xf32>
    %235 = arith.divf %233, %234 : vector<8x128xf32>
    %236 = vector.extract_strided_slice %229 {offsets = [0, 128], sizes = [8, 128], strides = [1, 1]} : vector<8x512xf32> to vector<8x128xf32>
    %237 = arith.negf %236 : vector<8x128xf32>
    %238 = math.exp %237 : vector<8x128xf32>
    %cst_81 = arith.constant 1.000000e+00 : f32
    %239 = vector.broadcast %cst_81 : f32 to vector<8x128xf32>
    %240 = arith.addf %239, %238 : vector<8x128xf32>
    %241 = arith.divf %239, %240 : vector<8x128xf32>
    %242 = vector.extract_strided_slice %229 {offsets = [0, 256], sizes = [8, 128], strides = [1, 1]} : vector<8x512xf32> to vector<8x128xf32>
    %243 = math.tanh %242 : vector<8x128xf32>
    %244 = vector.extract_strided_slice %229 {offsets = [0, 384], sizes = [8, 128], strides = [1, 1]} : vector<8x512xf32> to vector<8x128xf32>
    %245 = arith.negf %244 : vector<8x128xf32>
    %246 = math.exp %245 : vector<8x128xf32>
    %cst_82 = arith.constant 1.000000e+00 : f32
    %247 = vector.broadcast %cst_82 : f32 to vector<8x128xf32>
    %248 = arith.addf %247, %246 : vector<8x128xf32>
    %249 = arith.divf %247, %248 : vector<8x128xf32>
    %250 = arith.mulf %241, %217 : vector<8x128xf32>
    %251 = arith.mulf %235, %243 : vector<8x128xf32>
    %252 = arith.addf %250, %251 : vector<8x128xf32>
    %253 = math.tanh %252 : vector<8x128xf32>
    %254 = arith.mulf %249, %253 : vector<8x128xf32>
    %255 = arith.index_cast %c6_i32 : i32 to index
    %c0_83 = arith.constant 0 : index
    %c0_84 = arith.constant 0 : index
    %256 = vector.load %arg12[%255, %c0_83, %c0_84] : memref<8x8x128xf32, #tpu.memory_space<vmem>>, vector<1x8x128xf32>
    %257 = vector.shape_cast %256 : vector<1x8x128xf32> to vector<8x128xf32>
    %258 = vector.shape_cast %254 : vector<8x128xf32> to vector<1x8x128xf32>
    tpu.vector_store %arg12[%255, %c0_83, %c0_84], %258 {strides = array<i32>} : memref<8x8x128xf32, #tpu.memory_space<vmem>>, vector<1x8x128xf32>,
    %c7_i32 = arith.constant 7 : i32
    %259 = arith.index_cast %c7_i32 : i32 to index
    %c0_85 = arith.constant 0 : index
    %c0_86 = arith.constant 0 : index
    %260 = vector.load %arg11[%259, %c0_85, %c0_86] : memref<8x8x512xf32, #tpu.memory_space<vmem>>, vector<1x8x512xf32>
    %261 = vector.shape_cast %260 : vector<1x8x512xf32> to vector<8x512xf32>
    %c0_87 = arith.constant 0 : index
    %c0_88 = arith.constant 0 : index
    %262 = vector.load %arg4[%c0_87, %c0_88] : memref<128x512xf32, #tpu.memory_space<vmem>>, vector<128x512xf32>
    %cst_89 = arith.constant dense<0.000000e+00> : vector<8x512xf32>
    %263 = tpu.matmul %254, %262, %cst_89 {dimension_numbers = #tpu.dot_dimension_numbers<[1], [0], [0], [1], [0, 0, 1, 1], [], []>} : vector<8x128xf32>, vector<128x512xf32>, vector<8x512xf32> -> vector<8x512xf32>
    %264 = arith.addf %261, %263 : vector<8x512xf32>
    %265 = vector.extract_strided_slice %264 {offsets = [0, 0], sizes = [8, 128], strides = [1, 1]} : vector<8x512xf32> to vector<8x128xf32>
    %266 = arith.negf %265 : vector<8x128xf32>
    %267 = math.exp %266 : vector<8x128xf32>
    %cst_90 = arith.constant 1.000000e+00 : f32
    %268 = vector.broadcast %cst_90 : f32 to vector<8x128xf32>
    %269 = arith.addf %268, %267 : vector<8x128xf32>
    %270 = arith.divf %268, %269 : vector<8x128xf32>
    %271 = vector.extract_strided_slice %264 {offsets = [0, 128], sizes = [8, 128], strides = [1, 1]} : vector<8x512xf32> to vector<8x128xf32>
    %272 = arith.negf %271 : vector<8x128xf32>
    %273 = math.exp %272 : vector<8x128xf32>
    %cst_91 = arith.constant 1.000000e+00 : f32
    %274 = vector.broadcast %cst_91 : f32 to vector<8x128xf32>
    %275 = arith.addf %274, %273 : vector<8x128xf32>
    %276 = arith.divf %274, %275 : vector<8x128xf32>
    %277 = vector.extract_strided_slice %264 {offsets = [0, 256], sizes = [8, 128], strides = [1, 1]} : vector<8x512xf32> to vector<8x128xf32>
    %278 = math.tanh %277 : vector<8x128xf32>
    %279 = vector.extract_strided_slice %264 {offsets = [0, 384], sizes = [8, 128], strides = [1, 1]} : vector<8x512xf32> to vector<8x128xf32>
    %280 = arith.negf %279 : vector<8x128xf32>
    %281 = math.exp %280 : vector<8x128xf32>
    %cst_92 = arith.constant 1.000000e+00 : f32
    %282 = vector.broadcast %cst_92 : f32 to vector<8x128xf32>
    %283 = arith.addf %282, %281 : vector<8x128xf32>
    %284 = arith.divf %282, %283 : vector<8x128xf32>
    %285 = arith.mulf %276, %252 : vector<8x128xf32>
    %286 = arith.mulf %270, %278 : vector<8x128xf32>
    %287 = arith.addf %285, %286 : vector<8x128xf32>
    %288 = math.tanh %287 : vector<8x128xf32>
    %289 = arith.mulf %284, %288 : vector<8x128xf32>
    %290 = arith.index_cast %c7_i32 : i32 to index
    %c0_93 = arith.constant 0 : index
    %c0_94 = arith.constant 0 : index
    %291 = vector.load %arg12[%290, %c0_93, %c0_94] : memref<8x8x128xf32, #tpu.memory_space<vmem>>, vector<1x8x128xf32>
    %292 = vector.shape_cast %291 : vector<1x8x128xf32> to vector<8x128xf32>
    %293 = vector.shape_cast %289 : vector<8x128xf32> to vector<1x8x128xf32>
    tpu.vector_store %arg12[%290, %c0_93, %c0_94], %293 {strides = array<i32>} : memref<8x8x128xf32, #tpu.memory_space<vmem>>, vector<1x8x128xf32>,
    %c8_i32 = arith.constant 8 : i32
    %c0_95 = arith.constant 0 : index
    %c0_96 = arith.constant 0 : index
    %294 = vector.load %arg9[%c0_95, %c0_96] : memref<8x128xf32, #tpu.memory_space<vmem>>, vector<8x128xf32>
    tpu.vector_store %arg9[%c0_95, %c0_96], %289 {strides = array<i32>} : memref<8x128xf32, #tpu.memory_space<vmem>>, vector<8x128xf32>,
    %c0_97 = arith.constant 0 : index
    %c0_98 = arith.constant 0 : index
    %295 = vector.load %arg10[%c0_97, %c0_98] : memref<8x128xf32, #tpu.memory_space<vmem>>, vector<8x128xf32>
    tpu.vector_store %arg10[%c0_97, %c0_98], %287 {strides = array<i32>} : memref<8x128xf32, #tpu.memory_space<vmem>>, vector<8x128xf32>,
    %c0_99 = arith.constant 0 : index
    %c0_100 = arith.constant 0 : index
    %296 = vector.load %arg6[%c0_99, %c0_100] : memref<1x128xf32, #tpu.memory_space<vmem>>, vector<1x128xf32>
    %297 = vector.shape_cast %296 : vector<1x128xf32> to vector<1x1x128xf32>
    %c0_101 = arith.constant 0 : index
    %c0_102 = arith.constant 0 : index
    %c0_103 = arith.constant 0 : index
    %298 = vector.load %arg12[%c0_101, %c0_102, %c0_103] : memref<8x8x128xf32, #tpu.memory_space<vmem>>, vector<8x8x128xf32>
    %299 = vector.broadcast %297 : vector<1x1x128xf32> to vector<8x8x128xf32>
    %300 = arith.mulf %298, %299 : vector<8x8x128xf32>
    %cst_104 = arith.constant dense<0.000000e+00> : vector<8x8xf32>
    %301 = vector.multi_reduction <add>, %300, %cst_104 [2] : vector<8x8x128xf32> to vector<8x8xf32>
    %c0_105 = arith.constant 0 : index
    %c0_106 = arith.constant 0 : index
    %302 = vector.load %arg7[%c0_105, %c0_106] : memref<1x1xf32, #tpu.memory_space<vmem>>, vector<1x1xf32>
    %303 = vector.broadcast %302 : vector<1x1xf32> to vector<8x8xf32>
    %304 = arith.addf %301, %303 : vector<8x8xf32>
    %305 = arith.negf %304 : vector<8x8xf32>
    %306 = math.exp %305 : vector<8x8xf32>
    %cst_107 = arith.constant 1.000000e+00 : f32
    %307 = vector.broadcast %cst_107 : f32 to vector<8x8xf32>
    %308 = arith.addf %307, %306 : vector<8x8xf32>
    %309 = arith.divf %307, %308 : vector<8x8xf32>
    %310 = tpu.transpose %309, [1, 0] : vector<8x8xf32> -> vector<8x8xf32>
    %c0_108 = arith.constant 0 : index
    %c0_109 = arith.constant 0 : index
    %311 = vector.load %arg8[%c0_108, %c0_109] : memref<8x8xf32, #tpu.memory_space<vmem>>, vector<8x8xf32>
    tpu.vector_store %arg8[%c0_108, %c0_109], %310 {strides = array<i32>} : memref<8x8xf32, #tpu.memory_space<vmem>>, vector<8x8xf32>,
    return
  }
  func.func @transform_0(%arg0: i32, %arg1: i32) -> (i32, i32, i32) {
    %c0_i32 = arith.constant 0 : i32
    %c0_i32_0 = arith.constant 0 : i32
    return %arg1, %arg0, %c0_i32 : i32, i32, i32
  }
  func.func @transform_1(%arg0: i32, %arg1: i32) -> (i32, i32) {
    %c0_i32 = arith.constant 0 : i32
    %c0_i32_0 = arith.constant 0 : i32
    %c0_i32_1 = arith.constant 0 : i32
    return %c0_i32, %c0_i32_0 : i32, i32
  }
  func.func @transform_2(%arg0: i32, %arg1: i32) -> (i32, i32) {
    %c0_i32 = arith.constant 0 : i32
    %c0_i32_0 = arith.constant 0 : i32
    %c0_i32_1 = arith.constant 0 : i32
    return %c0_i32, %c0_i32_0 : i32, i32
  }
  func.func @transform_3(%arg0: i32, %arg1: i32) -> (i32, i32) {
    %c0_i32 = arith.constant 0 : i32
    %c0_i32_0 = arith.constant 0 : i32
    %c0_i32_1 = arith.constant 0 : i32
    return %c0_i32, %c0_i32_0 : i32, i32
  }
  func.func @transform_4(%arg0: i32, %arg1: i32) -> (i32, i32) {
    %c0_i32 = arith.constant 0 : i32
    %c0_i32_0 = arith.constant 0 : i32
    %c0_i32_1 = arith.constant 0 : i32
    return %c0_i32, %c0_i32_0 : i32, i32
  }
  func.func @transform_5(%arg0: i32, %arg1: i32) -> (i32, i32) {
    %c0_i32 = arith.constant 0 : i32
    %c0_i32_0 = arith.constant 0 : i32
    %c0_i32_1 = arith.constant 0 : i32
    return %c0_i32, %c0_i32_0 : i32, i32
  }
  func.func @transform_6(%arg0: i32, %arg1: i32) -> (i32, i32) {
    %c0_i32 = arith.constant 0 : i32
    return %arg0, %arg1 : i32, i32
  }
}

</mosaic_0001>

<bundles_post_ra>
// kernel: tpu_custom_call.1
= control target key start
LH: loop header
LB: loop body
LE: loop exit
PB: predicated region body
PF: predicated region fallthrough
CT: control target
= control target key end

     0   :  { %s4085_s0 = inlined_call_operand.hbm [shape: f32[8,8,9], index: 0, kind: input, shape index: {}]   ;;  %s4086_s1 = inlined_call_operand.hbm [shape: f32[9,512], index: 1, kind: input, shape index: {}]   ;;  %s4087_s2 = inlined_call_operand.hbm [shape: f32[128,512], index: 2, kind: input, shape index: {}]   ;;  %s4088_s3 = inlined_call_operand.vmem [shape: f32[1,512], index: 3, kind: input, shape index: {}]   ;;  %s4089_s4 = inlined_call_operand.vmem [shape: f32[1,128], index: 4, kind: input, shape index: {}]   ;;  %s4090_s5 = inlined_call_operand.<no memory space> [shape: f32[1,1], index: 5, kind: input, shape index: {}]   ;;  %s4091_s6 = inlined_call_operand.hbm [shape: f32[8,8], index: 6, kind: output, shape index: {}]  }
   0x1   :  { %v11_v0 = vstv %s4090_s5 }
   0x2   :  { %12 = vst [vmem:[#allocation6] sm:$0x1] %v11_v0 }
   0x3   :  { %13 = vsyncpa [#allocation8], 0 }
   0x4   :  { %14 = vsyncpa [#allocation11], 0 }
   0x5   :  { %15 = vsyncpa [#allocation9], 0  ;;  %s3458_s23 = smov [#allocation10]   ;;  %s3364_s27 = scalar_lea.hbm %s4086_s1, 1024 }
   0x6   :  { %s33_s24 = sshll.u32 %s3458_s23, 4  ;;  %p3365_p0 = scmp.ne.s32.totalorder %s4086_s1, %s3364_s27  ;;  %s34_s24 = int_to_ptr.vmem [resolvable:$true] %s33_s24 }
   0x7   :  { %p3368_p1 = scmp.lt.u32.totalorder %s3364_s27, %s4086_s1 }
   0x9   :  { %p3370_p2 = pnand %p3368_p1, %p3365_p0 }
   0xb   :  { %3373 = shalt.err (!%p3370_p2)
}
   0xc   :  { %s3374_s5 = scalar_lea.vmem %s34_s24, 1024  ;;  %p3379_p4 = scmp.lt.s32.totalorder %s34_s24, %s34_s24 }
   0xd   :  { %p3375_p3 = scmp.ne.s32.totalorder %s34_s24, %s3374_s5  ;;  %p3380_p5 = scmp.lt.s32.totalorder %s3374_s5, %s3374_s5 }
   0xf   :  { %p3381_p6 = por %p3380_p5, %p3379_p4 }
  0x11   :  { %p3382_p7 = pnand %p3381_p6, %p3375_p3 }
  0x13   :  { %3385 = shalt.err (!%p3382_p7)
}
  0x14   :  { %s3459_s8 = smov 512   ;;  %s3460_s9 = smov 32  }
  0x15   :  { %39 = dma.hbm_to_vmem [thread:$0]  %s4086_s1, 1024, %s34_s24, [#allocation11], %s3459_s8, %s3459_s8, %s3460_s9  }
  0x16   :  { %s3461_s12 = smov [#allocation7]   ;;  %s3386_s16 = scalar_lea.hbm %s4085_s0, 1024 }
  0x17   :  { %s21_s13 = sshll.u32 %s3461_s12, 4  ;;  %p3387_p8 = scmp.ne.s32.totalorder %s4085_s0, %s3386_s16  ;;  %s22_s13 = int_to_ptr.vmem [resolvable:$true] %s21_s13 }
  0x18   :  { %p3390_p9 = scmp.lt.u32.totalorder %s3386_s16, %s4085_s0 }
  0x1a   :  { %p3392_p10 = pnand %p3390_p9, %p3387_p8 }
  0x1c   :  { %3395 = shalt.err (!%p3392_p10)
}
  0x1d   :  { %s3396_s21 = scalar_lea.vmem %s22_s13, 1024  ;;  %p3401_p12 = scmp.lt.s32.totalorder %s22_s13, %s22_s13 }
  0x1e   :  { %p3397_p11 = scmp.ne.s32.totalorder %s22_s13, %s3396_s21  ;;  %p3402_p13 = scmp.lt.s32.totalorder %s3396_s21, %s3396_s21 }
  0x20   :  { %p3403_p0 = por %p3402_p13, %p3401_p12 }
  0x22   :  { %p3404_p1 = pnand %p3403_p0, %p3397_p11 }
  0x24   :  { %3407 = shalt.err (!%p3404_p1)
}
  0x25   :  { %s3462_s1 = smov 128   ;;  %s3463_s22 = smov 8  }
  0x26   :  { %27 = dma.hbm_to_vmem [thread:$0]  %s4085_s0, 1024, %s22_s13, [#allocation8], %s3462_s1, %s3462_s1, %s3463_s22  }
  0x27   :  { %s3464_s25 = smov [#allocation12]   ;;  %s3408_s29 = scalar_lea.hbm %s4087_s2, 8192 }
  0x28   :  { %s45_s26 = sshll.u32 %s3464_s25, 4  ;;  %p3409_p2 = scmp.ne.s32.totalorder %s4087_s2, %s3408_s29  ;;  %s46_s26 = int_to_ptr.vmem [resolvable:$true] %s45_s26 }
  0x29   :  { %p3412_p3 = scmp.lt.u32.totalorder %s3408_s29, %s4087_s2 }
  0x2b   :  { %p3414_p4 = pnand %p3412_p3, %p3409_p2 }
  0x2d   :  { %3417 = shalt.err (!%p3414_p4)
}
  0x2e   :  { %s3418_s11 = scalar_lea.vmem %s46_s26, 8192  ;;  %p3423_p6 = scmp.lt.s32.totalorder %s46_s26, %s46_s26 }
  0x2f   :  { %p3419_p5 = scmp.ne.s32.totalorder %s46_s26, %s3418_s11  ;;  %p3424_p7 = scmp.lt.s32.totalorder %s3418_s11, %s3418_s11 }
  0x31   :  { %p3425_p8 = por %p3424_p7, %p3423_p6 }
  0x33   :  { %p3426_p9 = pnand %p3425_p8, %p3419_p5 }
  0x35   :  { %3429 = shalt.err (!%p3426_p9)
}
  0x36   :  { %51 = dma.hbm_to_vmem [thread:$0]  %s4087_s2, 8192, %s46_s26, [#allocation11], %s3459_s8, %s3459_s8, %s3460_s9  }
  0x37   :  { %3452 = dma.done.wait [#allocation8], 1024  }
  0x38   :  { %3453 = vsyncadd [#allocation8], 4294966272 }
  0x39   :  { %3454 = dma.done.wait [#allocation11], 9216  }
  0x3a   :  { %3455 = vsyncadd [#allocation11], 4294958080  ;;  %v3465_v1 = vmov 0.0   ;;  %vm136_vm0 = vcmask 1040384   ;;  %vm3466_vm1 = vmmov 1   ;;  %v82_v3 = vld [vmem:[#allocation10 + $0x8] sm:$0xff] }
  0x3b   :  { %213 = vmatprep.mubr.f32.mxu0 %v3465_v1  ;;  %326 = vmatprep.mubr.f32.mxu1 %v3465_v1  ;;  %vm3551_vm2 = vmpackc.low %vm136_vm0, %vm3466_vm1  ;;  %v86_v4 = vld [vmem:[#allocation10 + $0x28] sm:$0x1]  ;;  %v84_v5 = vld [vmem:[#allocation10 + $0x18] sm:$0xff]  ;;  %vm111_vm3 = vcmask 72704   ;;  %vm2484_vm4 = vcmask 1041409   ;;  %vm2486_vm5 = vcmask 1042434  }
  0x3c   :  { %v2603_v6 = vpack.c.bf16 %v86_v4, %v82_v3  ;;  %v88_v7 = vld [vmem:[#allocation10 + $0x38] sm:$0x1]  ;;  %v81_v8 = vld [vmem:[#allocation10] sm:$0xff]  ;;  %v83_v12 = vld [vmem:[#allocation10 + $0x10] sm:$0xff]  ;;  %vm2488_vm6 = vcmask 1043459   ;;  %vm2490_vm7 = vcmask 1044484  }
  0x3d   :  { %v85_v9 = vld [vmem:[#allocation10 + $0x20] sm:$0x1]  ;;  %v2609_v10 = vpack.c.bf16 %v88_v7, %v84_v5  ;;  %v87_v13 = vld [vmem:[#allocation10 + $0x30] sm:$0x1]  ;;  %v414_v16 = vld [vmem:[#allocation12 + $0x8] sm:$0xff]  ;;  %vm2492_vm8 = vcmask 1045509  }
  0x3e   :  { %v2606_v11 = vpack.c.bf16 %v85_v9, %v81_v8  ;;  %v73_v14 = vld [vmem:[#allocation7] sm:$0xff]  ;;  %2605 = vmatprep.subr.msk.bf16.mxu0 %vm3551_vm2, %v2603_v6  ;;  %v2612_v15 = vpack.c.bf16 %v87_v13, %v83_v12  ;;  %v418_v17 = vld [vmem:[#allocation12 + $0x28] sm:$0xff]  ;;  %v416_v18 = vld [vmem:[#allocation12 + $0x18] sm:$0xff]  ;;  %vm2494_vm9 = vcmask 1046534   ;;  %vm2496_vm10 = vcmask 1047559  }
  0x3f   :  { %2611 = vmatprep.subr.msk.bf16.mxu1 %vm3551_vm2, %v2609_v10  ;;  %v3561_v19 = vpack.c.bf16 %v418_v17, %v414_v16  ;;  %v420_v20 = vld [vmem:[#allocation12 + $0x38] sm:$0xff]  ;;  %v413_v21 = vld [vmem:[#allocation12] sm:$0xff]  ;;  %v415_v25 = vld [vmem:[#allocation12 + $0x10] sm:$0xff]  ;;  %vm2531_vm11 = vcmask 64512  }
  0x40   :  { %2608 = vmatpush1.bf16.msk.msra.mxu0 %vm3551_vm2, %v2606_v11  ;;  %v417_v22 = vld [vmem:[#allocation12 + $0x20] sm:$0xff]  ;;  %2614 = vmatpush1.bf16.msk.msra.mxu1 %vm3551_vm2, %v2612_v15  ;;  %v3565_v23 = vpack.c.bf16 %v420_v20, %v416_v18  ;;  %v419_v26 = vld [vmem:[#allocation12 + $0x30] sm:$0xff]  ;;  %v422_v28 = vld [vmem:[#allocation12 + $0x48] sm:$0xff] }
  0x41   :  { %v3567_v24 = vpack.c.bf16 %v417_v22, %v413_v21  ;;  %2616 = vmatprep.subr.bf16.mxu0 %v3561_v19  ;;  %v3570_v27 = vpack.c.bf16 %v419_v26, %v415_v25  ;;  %v426_v29 = vld [vmem:[#allocation12 + $0x68] sm:$0xff]  ;;  %v424_v30 = vld [vmem:[#allocation12 + $0x58] sm:$0xff]  ;;  %v421_v33 = vld [vmem:[#allocation12 + $0x40] sm:$0xff] }
  0x42   :  { %2648 = vmatprep.subr.bf16.mxu1 %v3565_v23  ;;  %v3574_v31 = vpack.c.bf16 %v426_v29, %v422_v28  ;;  %v428_v32 = vld [vmem:[#allocation12 + $0x78] sm:$0xff]  ;;  %v425_v34 = vld [vmem:[#allocation12 + $0x60] sm:$0xff]  ;;  %v74_v35 = vld [vmem:[#allocation7 + $0x8] sm:$0xff] }
  0x43   :  { %2551 = vmatmul.mubr.msk.f32.vlgmr.msra.gmra.mrb[0].mxu0 %vm111_vm3, %v73_v14  ;;  %2561 = vmatmul.mubr.msk.f32.vlgmr.msra.gmra.mrb[0].mxu1 %vm111_vm3, %v73_v14  ;;  %v3578_v36 = vpack.c.bf16 %v428_v32, %v424_v30  ;;  %v3580_v37 = vpack.c.bf16 %v425_v34, %v421_v33  ;;  %v423_v38 = vld [vmem:[#allocation12 + $0x50] sm:$0xff]  ;;  %v430_v41 = vld [vmem:[#allocation12 + $0x88] sm:$0xff]  ;;  %v432_v43 = vld [vmem:[#allocation12 + $0x98] sm:$0xff] }
  0x44   :  { %2618 = vmatpush1.bf16.msra.mxu0 %v3567_v24  ;;  %v427_v39 = vld [vmem:[#allocation12 + $0x70] sm:$0xff]  ;;  %2650 = vmatpush1.bf16.msra.mxu1 %v3570_v27  ;;  %v434_v42 = vld [vmem:[#allocation12 + $0xa8] sm:$0xff]  ;;  %v436_v45 = vld [vmem:[#allocation12 + $0xb8] sm:$0xff] }
  0x45   :  { %219 = vmatprep.mubr.f32.mxu0 %v3465_v1  ;;  %v3584_v40 = vpack.c.bf16 %v427_v39, %v423_v38  ;;  %332 = vmatprep.mubr.f32.mxu1 %v3465_v1  ;;  %v3588_v44 = vpack.c.bf16 %v434_v42, %v430_v41  ;;  %v429_v46 = vld [vmem:[#allocation12 + $0x80] sm:$0xff]  ;;  %v75_v48 = vld [vmem:[#allocation7 + $0x10] sm:$0xff]  ;;  %v3592_v49 = vpack.c.bf16 %v436_v45, %v432_v43  ;;  %v438_v53 = vld [vmem:[#allocation12 + $0xc8] sm:$0xff] }
  0x46   :  { %2620 = vmatprep.subr.bf16.mxu0 %v3574_v31  ;;  %v433_v47 = vld [vmem:[#allocation12 + $0xa0] sm:$0xff]  ;;  %2652 = vmatprep.subr.bf16.mxu1 %v3578_v36  ;;  %v431_v50 = vld [vmem:[#allocation12 + $0x90] sm:$0xff]  ;;  %v442_v54 = vld [vmem:[#allocation12 + $0xe8] sm:$0xff] }
  0x47   :  { %2552 = vmatmul.mubr.msk.f32.gmra.mrb[2].mxu0 %vm111_vm3, %v74_v35  ;;  %v435_v51 = vld [vmem:[#allocation12 + $0xb0] sm:$0xff]  ;;  %2562 = vmatmul.mubr.msk.f32.gmra.mrb[2].mxu1 %vm111_vm3, %v74_v35  ;;  %v3596_v52 = vpack.c.bf16 %v433_v47, %v429_v46  ;;  %v440_v55 = vld [vmem:[#allocation12 + $0xd8] sm:$0xff]  ;;  %v437_v58 = vld [vmem:[#allocation12 + $0xc0] sm:$0xff]  ;;  %v3604_v60 = vpack.c.bf16 %v442_v54, %v438_v53 }
  0x48   :  { %2622 = vmatpush1.bf16.msra.mxu0 %v3580_v37  ;;  %2654 = vmatpush1.bf16.msra.mxu1 %v3584_v40  ;;  %v3600_v56 = vpack.c.bf16 %v435_v51, %v431_v50  ;;  %v444_v57 = vld [vmem:[#allocation12 + $0xf8] sm:$0xff]  ;;  %v441_v59 = vld [vmem:[#allocation12 + $0xe0] sm:$0xff]  ;;  %v439_v61 = vld [vmem:[#allocation12 + $0xd0] sm:$0xff] }
  0x49   :  { %225 = vmatprep.mubr.f32.mxu0 %v3465_v1  ;;  %338 = vmatprep.mubr.f32.mxu1 %v3465_v1  ;;  %v443_v62 = vld [vmem:[#allocation12 + $0xf0] sm:$0xff]  ;;  %v3608_v63 = vpack.c.bf16 %v444_v57, %v440_v55  ;;  %v446_v0 = vld [vmem:[#allocation12 + $0x108] sm:$0xff]  ;;  %v76_v3 = vld [vmem:[#allocation7 + $0x18] sm:$0xff]  ;;  %v3612_v4 = vpack.c.bf16 %v441_v59, %v437_v58 }
  0x4a   :  { %2624 = vmatprep.subr.bf16.mxu0 %v3588_v44  ;;  %2656 = vmatprep.subr.bf16.mxu1 %v3592_v49  ;;  %v450_v2 = vld [vmem:[#allocation12 + $0x128] sm:$0xff]  ;;  %v448_v5 = vld [vmem:[#allocation12 + $0x118] sm:$0xff]  ;;  %v3616_v7 = vpack.c.bf16 %v443_v62, %v439_v61  ;;  %v445_v8 = vld [vmem:[#allocation12 + $0x100] sm:$0xff] }
  0x4b   :  { %2553 = vmatmul.mubr.msk.f32.gmra.mrb[4].mxu0 %vm111_vm3, %v75_v48  ;;  %2563 = vmatmul.mubr.msk.f32.gmra.mrb[4].mxu1 %vm111_vm3, %v75_v48  ;;  %v452_v6 = vld [vmem:[#allocation12 + $0x138] sm:$0xff]  ;;  %v449_v9 = vld [vmem:[#allocation12 + $0x120] sm:$0xff]  ;;  %v3620_v10 = vpack.c.bf16 %v450_v2, %v446_v0  ;;  %v447_v11 = vld [vmem:[#allocation12 + $0x110] sm:$0xff] }
  0x4c   :  { %2626 = vmatpush1.bf16.msra.mxu0 %v3596_v52  ;;  %2658 = vmatpush1.bf16.msra.mxu1 %v3600_v56  ;;  %v451_v12 = vld [vmem:[#allocation12 + $0x130] sm:$0xff]  ;;  %v3624_v13 = vpack.c.bf16 %v452_v6, %v448_v5  ;;  %v454_v14 = vld [vmem:[#allocation12 + $0x148] sm:$0xff]  ;;  %v77_v16 = vld [vmem:[#allocation7 + $0x20] sm:$0xff]  ;;  %v3628_v17 = vpack.c.bf16 %v449_v9, %v445_v8  ;;  %v91_v9 = vlaneseq }
  0x4d   :  { %231 = vmatprep.mubr.f32.mxu0 %v3465_v1  ;;  %344 = vmatprep.mubr.f32.mxu1 %v3465_v1  ;;  %v458_v15 = vld [vmem:[#allocation12 + $0x168] sm:$0xff]  ;;  %v456_v18 = vld [vmem:[#allocation12 + $0x158] sm:$0xff]  ;;  %v3632_v21 = vpack.c.bf16 %v451_v12, %v447_v11  ;;  %v453_v22 = vld [vmem:[#allocation12 + $0x140] sm:$0xff] }
  0x4e   :  { %2628 = vmatprep.subr.bf16.mxu0 %v3604_v60  ;;  %2660 = vmatprep.subr.bf16.mxu1 %v3608_v63  ;;  %v460_v20 = vld [vmem:[#allocation12 + $0x178] sm:$0xff]  ;;  %v457_v25 = vld [vmem:[#allocation12 + $0x160] sm:$0xff]  ;;  %v3636_v26 = vpack.c.bf16 %v458_v15, %v454_v14  ;;  %v455_v28 = vld [vmem:[#allocation12 + $0x150] sm:$0xff]  ;;  %v3730_v11 = vshrl.u32 %v91_v9, 7 }
  0x4f   :  { %2554 = vmatmul.mubr.msk.f32.gmra.mrb[6].mxu0 %vm111_vm3, %v76_v3  ;;  %2564 = vmatmul.mubr.msk.f32.gmra.mrb[6].mxu1 %vm111_vm3, %v76_v3  ;;  %v459_v29 = vld [vmem:[#allocation12 + $0x170] sm:$0xff]  ;;  %v3640_v30 = vpack.c.bf16 %v460_v20, %v456_v18  ;;  %v462_v32 = vld [vmem:[#allocation12 + $0x188] sm:$0xff]  ;;  %v3644_v35 = vpack.c.bf16 %v457_v25, %v453_v22  ;;  %v464_v38 = vld [vmem:[#allocation12 + $0x198] sm:$0xff] }
  0x50   :  { %2630 = vmatpush1.bf16.msra.mxu0 %v3612_v4  ;;  %2662 = vmatpush1.bf16.msra.mxu1 %v3616_v7  ;;  %v466_v33 = vld [vmem:[#allocation12 + $0x1a8] sm:$0xff]  ;;  %v468_v39 = vld [vmem:[#allocation12 + $0x1b8] sm:$0xff]  ;;  %v3648_v41 = vpack.c.bf16 %v459_v29, %v455_v28  ;;  %v461_v42 = vld [vmem:[#allocation12 + $0x180] sm:$0xff]  ;;  %v93_v12 = vsub.s32 0, %v3730_v11  ;;  %v97_v15 = vsub.s32 1, %v3730_v11 }
  0x51   :  { %237 = vmatprep.mubr.f32.mxu0 %v3465_v1  ;;  %350 = vmatprep.mubr.f32.mxu1 %v3465_v1  ;;  %v78_v34 = vld [vmem:[#allocation7 + $0x28] sm:$0xff]  ;;  %v465_v43 = vld [vmem:[#allocation12 + $0x1a0] sm:$0xff]  ;;  %v3652_v45 = vpack.c.bf16 %v466_v33, %v462_v32  ;;  %v463_v46 = vld [vmem:[#allocation12 + $0x190] sm:$0xff]  ;;  %v3656_v48 = vpack.c.bf16 %v468_v39, %v464_v38  ;;  %v101_v38 = vsub.s32 2, %v3730_v11 }
  0x52   :  { %2632 = vmatprep.subr.bf16.mxu0 %v3620_v10  ;;  %2664 = vmatprep.subr.bf16.mxu1 %v3624_v13  ;;  %v467_v47 = vld [vmem:[#allocation12 + $0x1b0] sm:$0xff]  ;;  %v470_v50 = vld [vmem:[#allocation12 + $0x1c8] sm:$0xff]  ;;  %v3660_v54 = vpack.c.bf16 %v465_v43, %v461_v42  ;;  %v472_v55 = vld [vmem:[#allocation12 + $0x1d8] sm:$0xff] }
  0x53   :  { %2555 = vmatmul.mubr.msk.f32.gmra.mrb[8].mxu0 %vm111_vm3, %v77_v16  ;;  %2565 = vmatmul.mubr.msk.f32.gmra.mrb[8].mxu1 %vm111_vm3, %v77_v16  ;;  %v474_v51 = vld [vmem:[#allocation12 + $0x1e8] sm:$0xff]  ;;  %v79_v53 = vld [vmem:[#allocation7 + $0x30] sm:$0xff]  ;;  %v476_v57 = vld [vmem:[#allocation12 + $0x1f8] sm:$0xff]  ;;  %v3664_v58 = vpack.c.bf16 %v467_v47, %v463_v46 }
  0x54   :  { %2634 = vmatpush1.bf16.msra.mxu0 %v3628_v17  ;;  %2666 = vmatpush1.bf16.msra.mxu1 %v3632_v21  ;;  %v469_v59 = vld [vmem:[#allocation12 + $0x1c0] sm:$0xff]  ;;  %v3668_v62 = vpack.c.bf16 %v474_v51, %v470_v50  ;;  %v471_v0 = vld [vmem:[#allocation12 + $0x1d0] sm:$0xff]  ;;  %v3672_v3 = vpack.c.bf16 %v476_v57, %v472_v55  ;;  %v80_v5 = vld [vmem:[#allocation7 + $0x38] sm:$0xff] }
  0x55   :  { %243 = vmatprep.mubr.f32.mxu0 %v3465_v1  ;;  %356 = vmatprep.mubr.f32.mxu1 %v3465_v1  ;;  %v473_v61 = vld [vmem:[#allocation12 + $0x1e0] sm:$0xff]  ;;  %v475_v2 = vld [vmem:[#allocation12 + $0x1f0] sm:$0xff] }
  0x56   :  { %2636 = vmatprep.subr.bf16.mxu0 %v3636_v26  ;;  %2668 = vmatprep.subr.bf16.mxu1 %v3640_v30  ;;  %v3676_v6 = vpack.c.bf16 %v473_v61, %v469_v59  ;;  %v3680_v8 = vpack.c.bf16 %v475_v2, %v471_v0  ;;  %v89_v14 = vld [vmem:[%s4088_s3] sm:$0xf] }
  0x57   :  { %2556 = vmatmul.mubr.msk.f32.gmra.mrb[10].mxu0 %vm111_vm3, %v78_v34  ;;  %2566 = vmatmul.mubr.msk.f32.gmra.mrb[10].mxu1 %vm111_vm3, %v78_v34  ;;  %v3737_v16 = vrot.slane %v89_v14, %v93_v12  ;;  %v3739_v18 = vrot.slane %v89_v14, %v97_v15  ;;  %v3748_v42 = vrot.slane %v89_v14, %v101_v38 }
  0x58   :  { %2638 = vmatpush1.bf16.msra.mxu0 %v3644_v35  ;;  %2670 = vmatpush1.bf16.msra.mxu1 %v3648_v41 }
  0x59   :  { %249 = vmatprep.mubr.f32.mxu0 %v3465_v1  ;;  %362 = vmatprep.mubr.f32.mxu1 %v3465_v1 }
  0x5a   :  { %2640 = vmatprep.subr.bf16.mxu0 %v3652_v45  ;;  %2672 = vmatprep.subr.bf16.mxu1 %v3656_v48 }
  0x5b   :  { %2557 = vmatmul.mubr.msk.f32.gmra.mrb[12].mxu0 %vm111_vm3, %v79_v53  ;;  %2567 = vmatmul.mubr.msk.f32.gmra.mrb[12].mxu1 %vm111_vm3, %v79_v53 }
  0x5c   :  { %2642 = vmatpush1.bf16.msra.mxu0 %v3660_v54  ;;  %2674 = vmatpush1.bf16.msra.mxu1 %v3664_v58 }
  0x5d   :  { %255 = vmatprep.mubr.f32.mxu0 %v3465_v1  ;;  %368 = vmatprep.mubr.f32.mxu1 %v3465_v1 }
  0x5e   :  { %2644 = vmatprep.subr.bf16.mxu0 %v3668_v62  ;;  %2676 = vmatprep.subr.bf16.mxu1 %v3672_v3 }
  0x5f   :  { %2558 = vmatmul.mubr.msk.f32.gmra.mrb[14].mxu0 %vm111_vm3, %v80_v5  ;;  %2568 = vmatmul.mubr.msk.f32.gmra.mrb[14].mxu1 %vm111_vm3, %v80_v5 }
  0x60   :  { %2646 = vmatpush1.bf16.msra.mxu0 %v3676_v6  ;;  %2678 = vmatpush1.bf16.msra.mxu1 %v3680_v8 }
  0x61   :  { %541 = vmatprep.mubr.f32.mxu0 %v3465_v1  ;;  %612 = vmatprep.mubr.f32.mxu1 %v3465_v1 }
  0x62   :  { %2680 = vmatprep.subr.bf16.mxu0 %v3561_v19  ;;  %2712 = vmatprep.subr.bf16.mxu1 %v3565_v23 }
  0x63   :  { %542 = vmatmul.mubr.f32.vlgmr.msra.gmra.mrb[0].mxu0 %v3465_v1  ;;  %613 = vmatmul.mubr.f32.vlgmr.msra.gmra.mrb[0].mxu1 %v3465_v1 }
  0x64   :  { %2682 = vmatpush1.bf16.msra.mxu0 %v3567_v24  ;;  %2714 = vmatpush1.bf16.msra.mxu1 %v3570_v27 }
  0x65   :  { %2684 = vmatprep.subr.bf16.mxu0 %v3574_v31  ;;  %2716 = vmatprep.subr.bf16.mxu1 %v3578_v36 }
  0x66   :  { %781 = vmatprep.mubr.f32.mxu0 %v3465_v1  ;;  %852 = vmatprep.mubr.f32.mxu1 %v3465_v1 }
  0x68   :  { %2686 = vmatpush1.bf16.msra.mxu0 %v3580_v37  ;;  %2718 = vmatpush1.bf16.msra.mxu1 %v3584_v40 }
  0x69   :  { %2688 = vmatprep.subr.bf16.mxu0 %v3588_v44  ;;  %2720 = vmatprep.subr.bf16.mxu1 %v3592_v49 }
  0x6c   :  { %2690 = vmatpush1.bf16.msra.mxu0 %v3596_v52  ;;  %2722 = vmatpush1.bf16.msra.mxu1 %v3600_v56 }
  0x6d   :  { %2692 = vmatprep.subr.bf16.mxu0 %v3604_v60  ;;  %2724 = vmatprep.subr.bf16.mxu1 %v3608_v63 }
  0x70   :  { %2694 = vmatpush1.bf16.msra.mxu0 %v3612_v4  ;;  %2726 = vmatpush1.bf16.msra.mxu1 %v3616_v7 }
  0x71   :  { %2696 = vmatprep.subr.bf16.mxu0 %v3620_v10  ;;  %2728 = vmatprep.subr.bf16.mxu1 %v3624_v13 }
  0x74   :  { %2698 = vmatpush1.bf16.msra.mxu0 %v3628_v17  ;;  %2730 = vmatpush1.bf16.msra.mxu1 %v3632_v21 }
  0x75   :  { %2700 = vmatprep.subr.bf16.mxu0 %v3636_v26  ;;  %2732 = vmatprep.subr.bf16.mxu1 %v3640_v30 }
  0x78   :  { %2702 = vmatpush1.bf16.msra.mxu0 %v3644_v35  ;;  %2734 = vmatpush1.bf16.msra.mxu1 %v3648_v41 }
  0x79   :  { %2704 = vmatprep.subr.bf16.mxu0 %v3652_v45  ;;  %2736 = vmatprep.subr.bf16.mxu1 %v3656_v48 }
  0x7c   :  { %2706 = vmatpush1.bf16.msra.mxu0 %v3660_v54  ;;  %2738 = vmatpush1.bf16.msra.mxu1 %v3664_v58 }
  0x7d   :  { %2708 = vmatprep.subr.bf16.mxu0 %v3668_v62  ;;  %2740 = vmatprep.subr.bf16.mxu1 %v3672_v3 }
  0x80   :  { %2710 = vmatpush1.bf16.msra.mxu0 %v3676_v6  ;;  %2742 = vmatpush1.bf16.msra.mxu1 %v3680_v8 }
  0x81   :  { %2744 = vmatprep.subr.bf16.mxu0 %v3561_v19  ;;  %2776 = vmatprep.subr.bf16.mxu1 %v3565_v23  ;;  %v105_v19 = vsub.s32 3, %v3730_v11 }
  0x83   :  { %v3744_v34 = vrot.slane %v89_v14, %v105_v19 }
 0x136   :  { %v543_v20 = vpop.f32.mrb[0].mxu0  ;;  %v614_v22 = vpop.f32.mrb[0].mxu1 }
 0x137   :  { %v3127_v23 = vadd.f32 %v543_v20, %v3737_v16  ;;  %v545_v25 = vpop.f32.mrb[1].mxu0  ;;  %v616_v29 = vpop.f32.mrb[1].mxu1  ;;  %v3143_v46 = vadd.f32 %v614_v22, %v3748_v42  ;;  %v3757_v20 = vld [vmem:[%s4089_s4] ss:$0 sm:$0xff] }
 0x138   :  { %v3128_v28 = vadd.f32 %v545_v25, %v3739_v18  ;;  %v3144_v39 = vadd.f32 %v616_v29, %v3744_v34 }
 0x139   :  { %v2569_v32 = vmul.f32 -1.442695, %v3127_v23 }
 0x13a   :  { %v2570_v33 = vmul.f32 -1.442695, %v3128_v28  ;;  %v2571_v43 = vmul.f32 -1.442695, %v3144_v39 }
 0x13b   :  { %3203 = vpow2.f32 %v2569_v32 }
 0x13c   :  { %3205 = vpow2.f32 %v2570_v33 }
 0x13d   :  { %3207 = vpow2.f32 %v2571_v43 }
 0x13e   :  { %3209 = vtanh.f32 %v3143_v46 }
 0x145   :  { %v3204_v47 = vpop.eup %3203 }
 0x146   :  { %v3206_v50 = vpop.eup %3205  ;;  %v626_v51 = vadd.f32 1.0, %v3204_v47 }
 0x147   :  { %v632_v53 = vadd.f32 1.0, %v3206_v50  ;;  %v3208_v55 = vpop.eup %3207 }
 0x148   :  { %3211 = vrcp.f32 %v626_v51  ;;  %v3210_v57 = vpop.eup %3209  ;;  %v639_v2 = vadd.f32 1.0, %v3208_v55 }
 0x149   :  { %3213 = vrcp.f32 %v632_v53 }
 0x14a   :  { %3215 = vrcp.f32 %v639_v2  ;;  %v1138_v2 = vld [vmem:[#allocation12 + $0x18] sm:$0xff] }
 0x152   :  { %v3212_v59 = vpop.eup %3211 }
 0x153   :  { %v3214_v61 = vpop.eup %3213  ;;  %v643_v0 = vmul.f32 %v3212_v59, %v3210_v57 }
 0x154   :  { %v642_v5 = vmul.f32 0.0, %v3214_v61  ;;  %v3216_v14 = vpop.eup %3215  ;;  %v1136_v61 = vld [vmem:[#allocation12 + $0x8] sm:$0xff] }
 0x156   :  { %v3751_v12 = vadd.f32 %v643_v0, %v642_v5  ;;  %v1140_v0 = vld [vmem:[#allocation12 + $0x28] sm:$0xff] }
 0x157   :  { %v3803_v5 = vpack.c.bf16 %v1140_v0, %v1136_v61 }
 0x158   :  { %3217 = vtanh.f32 %v3751_v12 }
 0x162   :  { %v3218_v15 = vpop.eup %3217 }
 0x163   :  { %v646_v19 = vmul.f32 %v3218_v15, %v3216_v14  ;;  %v1135_v14 = vld [vmem:[#allocation12] sm:$0xff] }
 0x164   :  { %v1139_v15 = vld [vmem:[#allocation12 + $0x20] sm:$0xff] }
 0x165   :  { %782 = vmatmul.mubr.f32.vlgmr.msra.gmra.mrb[2].mxu0 %v646_v19  ;;  %853 = vmatmul.mubr.f32.vlgmr.msra.gmra.mrb[2].mxu1 %v646_v19  ;;  %v2352_v23 = vmul.f32 %v3757_v20, %v646_v19 }
 0x166   :  { %2746 = vmatpush1.bf16.msra.mxu0 %v3567_v24  ;;  %2778 = vmatpush1.bf16.msra.mxu1 %v3570_v27 }
 0x167   :  { %2360 = vadd.xlane.f32.xlu0 %v2352_v23  ;;  %2748 = vmatprep.subr.bf16.mxu0 %v3574_v31  ;;  %v3807_v23 = vpack.c.bf16 %v1139_v15, %v1135_v14 }
 0x168   :  { %2780 = vmatprep.subr.bf16.mxu1 %v3578_v36  ;;  %1022 = vmatprep.mubr.f32.mxu0 %v3465_v1 }
 0x169   :  { %1093 = vmatprep.mubr.f32.mxu1 %v3465_v1 }
 0x16a   :  { %2750 = vmatpush1.bf16.msra.mxu0 %v3580_v37  ;;  %2782 = vmatpush1.bf16.msra.mxu1 %v3584_v40 }
 0x16b   :  { %2752 = vmatprep.subr.bf16.mxu0 %v3588_v44  ;;  %2784 = vmatprep.subr.bf16.mxu1 %v3592_v49 }
 0x16e   :  { %2754 = vmatpush1.bf16.msra.mxu0 %v3596_v52  ;;  %2786 = vmatpush1.bf16.msra.mxu1 %v3600_v56 }
 0x16f   :  { %2756 = vmatprep.subr.bf16.mxu0 %v3604_v60  ;;  %2788 = vmatprep.subr.bf16.mxu1 %v3608_v63 }
 0x172   :  { %2758 = vmatpush1.bf16.msra.mxu0 %v3612_v4  ;;  %2790 = vmatpush1.bf16.msra.mxu1 %v3616_v7 }
 0x173   :  { %2760 = vmatprep.subr.bf16.mxu0 %v3620_v10  ;;  %2792 = vmatprep.subr.bf16.mxu1 %v3624_v13 }
 0x176   :  { %2762 = vmatpush1.bf16.msra.mxu0 %v3628_v17  ;;  %2794 = vmatpush1.bf16.msra.mxu1 %v3632_v21 }
 0x177   :  { %2764 = vmatprep.subr.bf16.mxu0 %v3636_v26  ;;  %2796 = vmatprep.subr.bf16.mxu1 %v3640_v30 }
 0x17a   :  { %2766 = vmatpush1.bf16.msra.mxu0 %v3644_v35  ;;  %2798 = vmatpush1.bf16.msra.mxu1 %v3648_v41 }
 0x17b   :  { %2768 = vmatprep.subr.bf16.mxu0 %v3652_v45  ;;  %2800 = vmatprep.subr.bf16.mxu1 %v3656_v48 }
 0x17e   :  { %2770 = vmatpush1.bf16.msra.mxu0 %v3660_v54  ;;  %2802 = vmatpush1.bf16.msra.mxu1 %v3664_v58 }
 0x17f   :  { %2772 = vmatprep.subr.bf16.mxu0 %v3668_v62  ;;  %2804 = vmatprep.subr.bf16.mxu1 %v3672_v3 }
 0x182   :  { %2774 = vmatpush1.bf16.msra.mxu0 %v3676_v6  ;;  %2806 = vmatpush1.bf16.msra.mxu1 %v3680_v8 }
 0x183   :  { %2808 = vmatprep.subr.bf16.mxu0 %v3803_v5 }
 0x238   :  { %v783_v24 = vpop.f32.mrb[2].mxu0  ;;  %v854_v27 = vpop.f32.mrb[2].mxu1 }
 0x239   :  { %v3129_v31 = vadd.f32 %v783_v24, %v3737_v16  ;;  %v785_v36 = vpop.f32.mrb[3].mxu0  ;;  %v856_v37 = vpop.f32.mrb[3].mxu1  ;;  %v3145_v22 = vadd.f32 %v854_v27, %v3748_v42  ;;  %v1137_v24 = vld [vmem:[#allocation12 + $0x10] sm:$0xff] }
 0x23a   :  { %v3130_v40 = vadd.f32 %v785_v36, %v3739_v18  ;;  %v3146_v52 = vadd.f32 %v856_v37, %v3744_v34  ;;  %v1141_v27 = vld [vmem:[#allocation12 + $0x30] sm:$0xff]  ;;  %v1144_v36 = vld [vmem:[#allocation12 + $0x48] sm:$0xff] }
 0x23b   :  { %v2572_v44 = vmul.f32 -1.442695, %v3129_v31  ;;  %v3810_v31 = vpack.c.bf16 %v1141_v27, %v1137_v24  ;;  %v1148_v37 = vld [vmem:[#allocation12 + $0x68] sm:$0xff] }
 0x23c   :  { %v2573_v49 = vmul.f32 -1.442695, %v3130_v40  ;;  %v2574_v56 = vmul.f32 -1.442695, %v3146_v52  ;;  %v1146_v40 = vld [vmem:[#allocation12 + $0x58] sm:$0xff]  ;;  %v1143_v52 = vld [vmem:[#allocation12 + $0x40] sm:$0xff] }
 0x23d   :  { %3219 = vpow2.f32 %v2572_v44  ;;  %v3815_v44 = vpack.c.bf16 %v1148_v37, %v1144_v36  ;;  %v1405_v36 = vld [vmem:[#allocation12 + $0xe8] sm:$0xff]  ;;  %v1403_v37 = vld [vmem:[#allocation12 + $0xd8] sm:$0xff] }
 0x23e   :  { %3221 = vpow2.f32 %v2573_v49  ;;  %v1150_v49 = vld [vmem:[#allocation12 + $0x78] sm:$0xff] }
 0x23f   :  { %3223 = vpow2.f32 %v2574_v56  ;;  %v1147_v56 = vld [vmem:[#allocation12 + $0x60] sm:$0xff] }
 0x240   :  { %3225 = vtanh.f32 %v3145_v22  ;;  %v3817_v22 = vpack.c.bf16 %v1150_v49, %v1146_v40  ;;  %v1407_v49 = vld [vmem:[#allocation12 + $0xf8] sm:$0xff] }
 0x247   :  { %v3220_v25 = vpop.eup %3219 }
 0x248   :  { %v3222_v28 = vpop.eup %3221  ;;  %v866_v29 = vadd.f32 1.0, %v3220_v25  ;;  %v3819_v25 = vpack.c.bf16 %v1147_v56, %v1143_v52  ;;  %v1400_v52 = vld [vmem:[#allocation12 + $0xc0] sm:$0xff] }
 0x249   :  { %v872_v32 = vadd.f32 1.0, %v3222_v28  ;;  %v3224_v33 = vpop.eup %3223  ;;  %v1145_v28 = vld [vmem:[#allocation12 + $0x50] sm:$0xff]  ;;  %v1404_v56 = vld [vmem:[#allocation12 + $0xe0] sm:$0xff] }
 0x24a   :  { %3227 = vrcp.f32 %v866_v29  ;;  %v3226_v38 = vpop.eup %3225  ;;  %v879_v47 = vadd.f32 1.0, %v3224_v33  ;;  %v1149_v29 = vld [vmem:[#allocation12 + $0x70] sm:$0xff]  ;;  %v1152_v33 = vld [vmem:[#allocation12 + $0x88] sm:$0xff] }
 0x24b   :  { %3229 = vrcp.f32 %v872_v32  ;;  %v3822_v32 = vpack.c.bf16 %v1149_v29, %v1145_v28  ;;  %v3884_v28 = vpack.c.bf16 %v1407_v49, %v1403_v37  ;;  %v3886_v29 = vpack.c.bf16 %v1404_v56, %v1400_v52  ;;  %v1430_v49 = vld [vmem:[#allocation12 + $0x1b0] sm:$0xff]  ;;  %v1433_v52 = vld [vmem:[#allocation12 + $0x1c8] sm:$0xff] }
 0x24c   :  { %3231 = vrcp.f32 %v879_v47  ;;  %v1151_v47 = vld [vmem:[#allocation12 + $0x80] sm:$0xff]  ;;  %v1437_v56 = vld [vmem:[#allocation12 + $0x1e8] sm:$0xff] }
 0x254   :  { %v3228_v39 = vpop.eup %3227 }
 0x255   :  { %v3230_v43 = vpop.eup %3229  ;;  %v883_v46 = vmul.f32 %v3228_v39, %v3226_v38  ;;  %v1156_v38 = vld [vmem:[#allocation12 + $0xa8] sm:$0xff]  ;;  %v1154_v39 = vld [vmem:[#allocation12 + $0x98] sm:$0xff] }
 0x256   :  { %v882_v50 = vmul.f32 %v3230_v43, %v3751_v12  ;;  %v3232_v53 = vpop.eup %3231  ;;  %v1142_v12 = vld [vmem:[#allocation12 + $0x38] sm:$0xff]  ;;  %v3827_v43 = vpack.c.bf16 %v1156_v38, %v1152_v33  ;;  %v1402_v33 = vld [vmem:[#allocation12 + $0xd0] sm:$0xff] }
 0x257   :  { %v3805_v19 = vpack.c.bf16 %v1142_v12, %v1138_v2  ;;  %v1406_v38 = vld [vmem:[#allocation12 + $0xf0] sm:$0xff] }
 0x258   :  { %v3797_v51 = vadd.f32 %v883_v46, %v882_v50  ;;  %v1158_v46 = vld [vmem:[#allocation12 + $0xb8] sm:$0xff]  ;;  %v1155_v50 = vld [vmem:[#allocation12 + $0xa0] sm:$0xff] }
 0x259   :  { %2840 = vmatprep.subr.bf16.mxu1 %v3805_v19 }
 0x25a   :  { %3233 = vtanh.f32 %v3797_v51 }
 0x264   :  { %v3234_v55 = vpop.eup %3233 }
 0x265   :  { %v886_v57 = vmul.f32 %v3234_v55, %v3232_v53  ;;  %v3829_v53 = vpack.c.bf16 %v1158_v46, %v1154_v39  ;;  %v3831_v55 = vpack.c.bf16 %v1155_v50, %v1151_v47  ;;  %v3889_v39 = vpack.c.bf16 %v1406_v38, %v1402_v33  ;;  %v1409_v46 = vld [vmem:[#allocation12 + $0x108] sm:$0xff]  ;;  %v1411_v50 = vld [vmem:[#allocation12 + $0x118] sm:$0xff] }
 0x266   :  { %v1413_v47 = vld [vmem:[#allocation12 + $0x128] sm:$0xff]  ;;  %v3927_v38 = vpack.c.bf16 %v1437_v56, %v1433_v52 }
 0x267   :  { %1023 = vmatmul.mubr.f32.vlgmr.msra.gmra.mrb[4].mxu0 %v886_v57  ;;  %1094 = vmatmul.mubr.f32.vlgmr.msra.gmra.mrb[4].mxu1 %v886_v57  ;;  %v2353_v59 = vmul.f32 %v3757_v20, %v886_v57  ;;  %v1153_v57 = vld [vmem:[#allocation12 + $0x90] sm:$0xff] }
 0x268   :  { %1263 = vmatprep.mubr.f32.mxu0 %v3465_v1  ;;  %1334 = vmatprep.mubr.f32.mxu1 %v3465_v1 }
 0x269   :  { %2362 = vadd.xlane.f32.xlu0 %v2353_v59  ;;  %2810 = vmatpush1.bf16.msra.mxu0 %v3807_v23  ;;  %v1157_v59 = vld [vmem:[#allocation12 + $0xb0] sm:$0xff] }
 0x26a   :  { %2842 = vmatpush1.bf16.msra.mxu1 %v3810_v31  ;;  %2812 = vmatprep.subr.bf16.mxu0 %v3815_v44  ;;  %v3834_v61 = vpack.c.bf16 %v1157_v59, %v1153_v57  ;;  %v3894_v57 = vpack.c.bf16 %v1413_v47, %v1409_v46  ;;  %v1415_v59 = vld [vmem:[#allocation12 + $0x138] sm:$0xff] }
 0x26b   :  { %2844 = vmatprep.subr.bf16.mxu1 %v3817_v22  ;;  %v1435_v46 = vld [vmem:[#allocation12 + $0x1d8] sm:$0xff] }
 0x26c   :  { %v1439_v47 = vld [vmem:[#allocation12 + $0x1f8] sm:$0xff] }
 0x26d   :  { %2814 = vmatpush1.bf16.msra.mxu0 %v3819_v25 }
 0x26e   :  { %2846 = vmatpush1.bf16.msra.mxu1 %v3822_v32  ;;  %2816 = vmatprep.subr.bf16.mxu0 %v3827_v43 }
 0x26f   :  { %2848 = vmatprep.subr.bf16.mxu1 %v3829_v53 }
 0x271   :  { %2818 = vmatpush1.bf16.msra.mxu0 %v3831_v55 }
 0x272   :  { %2850 = vmatpush1.bf16.msra.mxu1 %v3834_v61  ;;  %2820 = vmatprep.subr.bf16.mxu0 %v3604_v60 }
 0x273   :  { %2852 = vmatprep.subr.bf16.mxu1 %v3608_v63 }
 0x275   :  { %2822 = vmatpush1.bf16.msra.mxu0 %v3612_v4 }
 0x276   :  { %2854 = vmatpush1.bf16.msra.mxu1 %v3616_v7  ;;  %2824 = vmatprep.subr.bf16.mxu0 %v3620_v10 }
 0x277   :  { %2856 = vmatprep.subr.bf16.mxu1 %v3624_v13 }
 0x279   :  { %2826 = vmatpush1.bf16.msra.mxu0 %v3628_v17 }
 0x27a   :  { %2858 = vmatpush1.bf16.msra.mxu1 %v3632_v21  ;;  %2828 = vmatprep.subr.bf16.mxu0 %v3636_v26 }
 0x27b   :  { %2860 = vmatprep.subr.bf16.mxu1 %v3640_v30 }
 0x27d   :  { %2830 = vmatpush1.bf16.msra.mxu0 %v3644_v35 }
 0x27e   :  { %2862 = vmatpush1.bf16.msra.mxu1 %v3648_v41  ;;  %2832 = vmatprep.subr.bf16.mxu0 %v3652_v45 }
 0x27f   :  { %2864 = vmatprep.subr.bf16.mxu1 %v3656_v48 }
 0x281   :  { %2834 = vmatpush1.bf16.msra.mxu0 %v3660_v54 }
 0x282   :  { %2866 = vmatpush1.bf16.msra.mxu1 %v3664_v58  ;;  %2836 = vmatprep.subr.bf16.mxu0 %v3668_v62 }
 0x283   :  { %2868 = vmatprep.subr.bf16.mxu1 %v3672_v3 }
 0x285   :  { %2838 = vmatpush1.bf16.msra.mxu0 %v3676_v6 }
 0x286   :  { %2870 = vmatpush1.bf16.msra.mxu1 %v3680_v8  ;;  %2872 = vmatprep.subr.bf16.mxu0 %v3803_v5 }
 0x287   :  { %2904 = vmatprep.subr.bf16.mxu1 %v3805_v19 }
 0x33a   :  { %v1024_v60 = vpop.f32.mrb[4].mxu0  ;;  %v1095_v63 = vpop.f32.mrb[4].mxu1 }
 0x33b   :  { %v3131_v4 = vadd.f32 %v1024_v60, %v3737_v16  ;;  %v1026_v7 = vpop.f32.mrb[5].mxu0  ;;  %v1097_v10 = vpop.f32.mrb[5].mxu1  ;;  %v3147_v35 = vadd.f32 %v1095_v63, %v3748_v42  ;;  %v1408_v60 = vld [vmem:[#allocation12 + $0x100] sm:$0xff] }
 0x33c   :  { %v3132_v13 = vadd.f32 %v1026_v7, %v3739_v18  ;;  %v3148_v26 = vadd.f32 %v1097_v10, %v3744_v34  ;;  %v1412_v63 = vld [vmem:[#allocation12 + $0x120] sm:$0xff]  ;;  %v1410_v10 = vld [vmem:[#allocation12 + $0x110] sm:$0xff] }
 0x33d   :  { %v2575_v17 = vmul.f32 -1.442695, %v3131_v4  ;;  %v3896_v4 = vpack.c.bf16 %v1415_v59, %v1411_v50  ;;  %v3898_v7 = vpack.c.bf16 %v1412_v63, %v1408_v60  ;;  %v1432_v50 = vld [vmem:[#allocation12 + $0x1c0] sm:$0xff]  ;;  %v3930_v59 = vpack.c.bf16 %v1439_v47, %v1435_v46  ;;  %v1434_v63 = vld [vmem:[#allocation12 + $0x1d0] sm:$0xff] }
 0x33e   :  { %v2576_v21 = vmul.f32 -1.442695, %v3132_v13  ;;  %v2577_v30 = vmul.f32 -1.442695, %v3148_v26  ;;  %v1414_v13 = vld [vmem:[#allocation12 + $0x130] sm:$0xff]  ;;  %v1421_v26 = vld [vmem:[#allocation12 + $0x168] sm:$0xff] }
 0x33f   :  { %3235 = vpow2.f32 %v2575_v17  ;;  %v3901_v17 = vpack.c.bf16 %v1414_v13, %v1410_v10  ;;  %v1436_v60 = vld [vmem:[#allocation12 + $0x1e0] sm:$0xff]  ;;  %v1438_v10 = vld [vmem:[#allocation12 + $0x1f0] sm:$0xff] }
 0x340   :  { %3237 = vpow2.f32 %v2576_v21  ;;  %v1417_v21 = vld [vmem:[#allocation12 + $0x148] sm:$0xff]  ;;  %v3933_v13 = vpack.c.bf16 %v1436_v60, %v1432_v50 }
 0x341   :  { %3239 = vpow2.f32 %v2577_v30  ;;  %v1419_v30 = vld [vmem:[#allocation12 + $0x158] sm:$0xff] }
 0x342   :  { %3241 = vtanh.f32 %v3147_v35  ;;  %v3905_v35 = vpack.c.bf16 %v1421_v26, %v1417_v21  ;;  %v3937_v21 = vpack.c.bf16 %v1438_v10, %v1434_v63 }
 0x349   :  { %v3236_v41 = vpop.eup %3235 }
 0x34a   :  { %v3238_v45 = vpop.eup %3237  ;;  %v1107_v48 = vadd.f32 1.0, %v3236_v41  ;;  %v1423_v41 = vld [vmem:[#allocation12 + $0x178] sm:$0xff] }
 0x34b   :  { %v1113_v54 = vadd.f32 1.0, %v3238_v45  ;;  %v3240_v58 = vpop.eup %3239  ;;  %v1416_v45 = vld [vmem:[#allocation12 + $0x140] sm:$0xff] }
 0x34c   :  { %3243 = vrcp.f32 %v1107_v48  ;;  %v3242_v62 = vpop.eup %3241  ;;  %v1120_v0 = vadd.f32 1.0, %v3240_v58  ;;  %v1420_v48 = vld [vmem:[#allocation12 + $0x160] sm:$0xff] }
 0x34d   :  { %3245 = vrcp.f32 %v1113_v54  ;;  %v3908_v54 = vpack.c.bf16 %v1423_v41, %v1419_v30  ;;  %v3910_v58 = vpack.c.bf16 %v1420_v48, %v1416_v45 }
 0x34e   :  { %3247 = vrcp.f32 %v1120_v0  ;;  %v1429_v0 = vld [vmem:[#allocation12 + $0x1a8] sm:$0xff] }
 0x356   :  { %v3244_v3 = vpop.eup %3243 }
 0x357   :  { %v3246_v6 = vpop.eup %3245  ;;  %v1124_v8 = vmul.f32 %v3244_v3, %v3242_v62  ;;  %v1418_v62 = vld [vmem:[#allocation12 + $0x150] sm:$0xff] }
 0x358   :  { %v1123_v2 = vmul.f32 %v3246_v6, %v3797_v51  ;;  %v3248_v14 = vpop.eup %3247  ;;  %v1401_v51 = vld [vmem:[#allocation12 + $0xc8] sm:$0xff]  ;;  %v1422_v3 = vld [vmem:[#allocation12 + $0x170] sm:$0xff] }
 0x359   :  { %v3882_v40 = vpack.c.bf16 %v1405_v36, %v1401_v51  ;;  %v1425_v6 = vld [vmem:[#allocation12 + $0x188] sm:$0xff]  ;;  %v1428_v51 = vld [vmem:[#allocation12 + $0x1a0] sm:$0xff]  ;;  %v1426_v36 = vld [vmem:[#allocation12 + $0x190] sm:$0xff] }
 0x35a   :  { %v3866_v12 = vadd.f32 %v1124_v8, %v1123_v2  ;;  %v3913_v8 = vpack.c.bf16 %v1422_v3, %v1418_v62  ;;  %v1427_v2 = vld [vmem:[#allocation12 + $0x198] sm:$0xff]  ;;  %v3925_v33 = vpack.c.bf16 %v1430_v49, %v1426_v36 }
 0x35c   :  { %3249 = vtanh.f32 %v3866_v12 }
 0x366   :  { %v3250_v15 = vpop.eup %3249 }
 0x367   :  { %v1127_v24 = vmul.f32 %v3250_v15, %v3248_v14  ;;  %v1431_v14 = vld [vmem:[#allocation12 + $0x1b8] sm:$0xff]  ;;  %v3916_v15 = vpack.c.bf16 %v1429_v0, %v1425_v6 }
 0x369   :  { %1264 = vmatmul.mubr.f32.vlgmr.msra.gmra.mrb[6].mxu0 %v1127_v24  ;;  %1335 = vmatmul.mubr.f32.vlgmr.msra.gmra.mrb[6].mxu1 %v1127_v24  ;;  %v2354_v27 = vmul.f32 %v3757_v20, %v1127_v24  ;;  %v3918_v24 = vpack.c.bf16 %v1431_v14, %v1427_v2 }
 0x36a   :  { %2874 = vmatpush1.bf16.msra.mxu0 %v3807_v23  ;;  %2906 = vmatpush1.bf16.msra.mxu1 %v3810_v31 }
 0x36b   :  { %2364 = vadd.xlane.f32.xlu1 %v2354_v27  ;;  %2876 = vmatprep.subr.bf16.mxu0 %v3815_v44  ;;  %v1424_v27 = vld [vmem:[#allocation12 + $0x180] sm:$0xff] }
 0x36c   :  { %2908 = vmatprep.subr.bf16.mxu1 %v3817_v22  ;;  %1504 = vmatprep.mubr.f32.mxu0 %v3465_v1  ;;  %v3921_v37 = vpack.c.bf16 %v1428_v51, %v1424_v27 }
 0x36d   :  { %1575 = vmatprep.mubr.f32.mxu1 %v3465_v1 }
 0x36e   :  { %2878 = vmatpush1.bf16.msra.mxu0 %v3819_v25  ;;  %2910 = vmatpush1.bf16.msra.mxu1 %v3822_v32 }
 0x36f   :  { %2880 = vmatprep.subr.bf16.mxu0 %v3827_v43  ;;  %2912 = vmatprep.subr.bf16.mxu1 %v3829_v53 }
 0x372   :  { %2882 = vmatpush1.bf16.msra.mxu0 %v3831_v55  ;;  %2914 = vmatpush1.bf16.msra.mxu1 %v3834_v61 }
 0x373   :  { %2884 = vmatprep.subr.bf16.mxu0 %v3882_v40  ;;  %2916 = vmatprep.subr.bf16.mxu1 %v3884_v28 }
 0x376   :  { %2886 = vmatpush1.bf16.msra.mxu0 %v3886_v29  ;;  %2918 = vmatpush1.bf16.msra.mxu1 %v3889_v39 }
 0x377   :  { %2888 = vmatprep.subr.bf16.mxu0 %v3894_v57  ;;  %2920 = vmatprep.subr.bf16.mxu1 %v3896_v4 }
 0x37a   :  { %2890 = vmatpush1.bf16.msra.mxu0 %v3898_v7  ;;  %2922 = vmatpush1.bf16.msra.mxu1 %v3901_v17 }
 0x37b   :  { %2892 = vmatprep.subr.bf16.mxu0 %v3905_v35  ;;  %2924 = vmatprep.subr.bf16.mxu1 %v3908_v54 }
 0x37e   :  { %2894 = vmatpush1.bf16.msra.mxu0 %v3910_v58  ;;  %2926 = vmatpush1.bf16.msra.mxu1 %v3913_v8 }
 0x37f   :  { %2896 = vmatprep.subr.bf16.mxu0 %v3916_v15  ;;  %2928 = vmatprep.subr.bf16.mxu1 %v3918_v24 }
 0x382   :  { %2898 = vmatpush1.bf16.msra.mxu0 %v3921_v37  ;;  %2930 = vmatpush1.bf16.msra.mxu1 %v3925_v33 }
 0x383   :  { %2900 = vmatprep.subr.bf16.mxu0 %v3927_v38  ;;  %2932 = vmatprep.subr.bf16.mxu1 %v3930_v59 }
 0x386   :  { %2902 = vmatpush1.bf16.msra.mxu0 %v3933_v13  ;;  %2934 = vmatpush1.bf16.msra.mxu1 %v3937_v21 }
 0x387   :  { %2936 = vmatprep.subr.bf16.mxu0 %v3803_v5  ;;  %2968 = vmatprep.subr.bf16.mxu1 %v3805_v19 }
 0x43c   :  { %v1265_v26 = vpop.f32.mrb[6].mxu0  ;;  %v1336_v30 = vpop.f32.mrb[6].mxu1 }
 0x43d   :  { %v3133_v41 = vadd.f32 %v1265_v26, %v3737_v16  ;;  %v1267_v45 = vpop.f32.mrb[7].mxu0  ;;  %v1338_v48 = vpop.f32.mrb[7].mxu1  ;;  %v3149_v14 = vadd.f32 %v1336_v30, %v3748_v42 }
 0x43e   :  { %v3134_v62 = vadd.f32 %v1267_v45, %v3739_v18  ;;  %v3150_v0 = vadd.f32 %v1338_v48, %v3744_v34 }
 0x43f   :  { %v2578_v3 = vmul.f32 -1.442695, %v3133_v41 }
 0x440   :  { %v2579_v6 = vmul.f32 -1.442695, %v3134_v62  ;;  %v2580_v2 = vmul.f32 -1.442695, %v3150_v0 }
 0x441   :  { %3251 = vpow2.f32 %v2578_v3 }
 0x442   :  { %3253 = vpow2.f32 %v2579_v6 }
 0x443   :  { %3255 = vpow2.f32 %v2580_v2 }
 0x444   :  { %3257 = vtanh.f32 %v3149_v14 }
 0x44b   :  { %v3252_v27 = vpop.eup %3251 }
 0x44c   :  { %v3254_v51 = vpop.eup %3253  ;;  %v1348_v36 = vadd.f32 1.0, %v3252_v27 }
 0x44d   :  { %v1354_v49 = vadd.f32 1.0, %v3254_v51  ;;  %v3256_v52 = vpop.eup %3255 }
 0x44e   :  { %3259 = vrcp.f32 %v1348_v36  ;;  %v3258_v56 = vpop.eup %3257  ;;  %v1361_v60 = vadd.f32 1.0, %v3256_v52 }
 0x44f   :  { %3261 = vrcp.f32 %v1354_v49 }
 0x450   :  { %3263 = vrcp.f32 %v1361_v60 }
 0x458   :  { %v3260_v46 = vpop.eup %3259 }
 0x459   :  { %v3262_v47 = vpop.eup %3261  ;;  %v1365_v50 = vmul.f32 %v3260_v46, %v3258_v56 }
 0x45a   :  { %v1364_v63 = vmul.f32 %v3262_v47, %v3866_v12  ;;  %v3264_v26 = vpop.eup %3263 }
 0x45c   :  { %v3949_v10 = vadd.f32 %v1365_v50, %v1364_v63 }
 0x45e   :  { %3265 = vtanh.f32 %v3949_v10 }
 0x468   :  { %v3266_v30 = vpop.eup %3265 }
 0x469   :  { %v1368_v41 = vmul.f32 %v3266_v30, %v3264_v26 }
 0x46b   :  { %1505 = vmatmul.mubr.f32.vlgmr.msra.gmra.mrb[8].mxu0 %v1368_v41  ;;  %1576 = vmatmul.mubr.f32.vlgmr.msra.gmra.mrb[8].mxu1 %v1368_v41  ;;  %v2355_v45 = vmul.f32 %v3757_v20, %v1368_v41 }
 0x46c   :  { %2938 = vmatpush1.bf16.msra.mxu0 %v3807_v23  ;;  %2970 = vmatpush1.bf16.msra.mxu1 %v3810_v31 }
 0x46d   :  { %2366 = vadd.xlane.f32.xlu1 %v2355_v45  ;;  %2940 = vmatprep.subr.bf16.mxu0 %v3815_v44 }
 0x46e   :  { %2972 = vmatprep.subr.bf16.mxu1 %v3817_v22  ;;  %1745 = vmatprep.mubr.f32.mxu0 %v3465_v1 }
 0x46f   :  { %1816 = vmatprep.mubr.f32.mxu1 %v3465_v1 }
 0x470   :  { %2942 = vmatpush1.bf16.msra.mxu0 %v3819_v25  ;;  %2974 = vmatpush1.bf16.msra.mxu1 %v3822_v32 }
 0x471   :  { %2944 = vmatprep.subr.bf16.mxu0 %v3827_v43  ;;  %2976 = vmatprep.subr.bf16.mxu1 %v3829_v53 }
 0x474   :  { %2946 = vmatpush1.bf16.msra.mxu0 %v3831_v55  ;;  %2978 = vmatpush1.bf16.msra.mxu1 %v3834_v61 }
 0x475   :  { %2948 = vmatprep.subr.bf16.mxu0 %v3882_v40  ;;  %2980 = vmatprep.subr.bf16.mxu1 %v3884_v28 }
 0x478   :  { %2950 = vmatpush1.bf16.msra.mxu0 %v3886_v29  ;;  %2982 = vmatpush1.bf16.msra.mxu1 %v3889_v39 }
 0x479   :  { %2952 = vmatprep.subr.bf16.mxu0 %v3894_v57  ;;  %2984 = vmatprep.subr.bf16.mxu1 %v3896_v4 }
 0x47c   :  { %2954 = vmatpush1.bf16.msra.mxu0 %v3898_v7  ;;  %2986 = vmatpush1.bf16.msra.mxu1 %v3901_v17 }
 0x47d   :  { %2956 = vmatprep.subr.bf16.mxu0 %v3905_v35  ;;  %2988 = vmatprep.subr.bf16.mxu1 %v3908_v54 }
 0x480   :  { %2958 = vmatpush1.bf16.msra.mxu0 %v3910_v58  ;;  %2990 = vmatpush1.bf16.msra.mxu1 %v3913_v8 }
 0x481   :  { %2960 = vmatprep.subr.bf16.mxu0 %v3916_v15  ;;  %2992 = vmatprep.subr.bf16.mxu1 %v3918_v24 }
 0x484   :  { %2962 = vmatpush1.bf16.msra.mxu0 %v3921_v37  ;;  %2994 = vmatpush1.bf16.msra.mxu1 %v3925_v33 }
 0x485   :  { %2964 = vmatprep.subr.bf16.mxu0 %v3927_v38  ;;  %2996 = vmatprep.subr.bf16.mxu1 %v3930_v59 }
 0x488   :  { %2966 = vmatpush1.bf16.msra.mxu0 %v3933_v13  ;;  %2998 = vmatpush1.bf16.msra.mxu1 %v3937_v21 }
 0x489   :  { %3000 = vmatprep.subr.bf16.mxu0 %v3803_v5  ;;  %3032 = vmatprep.subr.bf16.mxu1 %v3805_v19 }
 0x53e   :  { %v1506_v12 = vpop.f32.mrb[8].mxu0  ;;  %v1577_v48 = vpop.f32.mrb[8].mxu1 }
 0x53f   :  { %v3135_v62 = vadd.f32 %v1506_v12, %v3737_v16  ;;  %v1508_v3 = vpop.f32.mrb[9].mxu0  ;;  %v1579_v6 = vpop.f32.mrb[9].mxu1  ;;  %v3151_v36 = vadd.f32 %v1577_v48, %v3748_v42 }
 0x540   :  { %v3136_v0 = vadd.f32 %v1508_v3, %v3739_v18  ;;  %v3152_v27 = vadd.f32 %v1579_v6, %v3744_v34 }
 0x541   :  { %v2581_v2 = vmul.f32 -1.442695, %v3135_v62 }
 0x542   :  { %v2582_v14 = vmul.f32 -1.442695, %v3136_v0  ;;  %v2583_v51 = vmul.f32 -1.442695, %v3152_v27 }
 0x543   :  { %3267 = vpow2.f32 %v2581_v2 }
 0x544   :  { %3269 = vpow2.f32 %v2582_v14 }
 0x545   :  { %3271 = vpow2.f32 %v2583_v51 }
 0x546   :  { %3273 = vtanh.f32 %v3151_v36 }
 0x54d   :  { %v3268_v5 = vpop.eup %3267 }
 0x54e   :  { %v3270_v49 = vpop.eup %3269  ;;  %v1589_v19 = vadd.f32 1.0, %v3268_v5 }
 0x54f   :  { %v1595_v52 = vadd.f32 1.0, %v3270_v49  ;;  %v3272_v56 = vpop.eup %3271 }
 0x550   :  { %3275 = vrcp.f32 %v1589_v19  ;;  %v3274_v46 = vpop.eup %3273  ;;  %v1602_v63 = vadd.f32 1.0, %v3272_v56 }
 0x551   :  { %3277 = vrcp.f32 %v1595_v52 }
 0x552   :  { %3279 = vrcp.f32 %v1602_v63  ;;  %v2102_v63 = vld [vmem:[#allocation12 + $0x18] sm:$0xff] }
 0x55a   :  { %v3276_v47 = vpop.eup %3275 }
 0x55b   :  { %v3278_v50 = vpop.eup %3277  ;;  %v1606_v60 = vmul.f32 %v3276_v47, %v3274_v46 }
 0x55c   :  { %v1605_v26 = vmul.f32 %v3278_v50, %v3949_v10  ;;  %v3280_v41 = vpop.eup %3279  ;;  %v2100_v50 = vld [vmem:[#allocation12 + $0x8] sm:$0xff] }
 0x55e   :  { %v3992_v30 = vadd.f32 %v1606_v60, %v1605_v26  ;;  %v2104_v60 = vld [vmem:[#allocation12 + $0x28] sm:$0xff] }
 0x55f   :  { %v3063_v26 = vpack.c.bf16 %v2104_v60, %v2100_v50 }
 0x560   :  { %3281 = vtanh.f32 %v3992_v30 }
 0x56a   :  { %v3282_v45 = vpop.eup %3281 }
 0x56b   :  { %v1609_v12 = vmul.f32 %v3282_v45, %v3280_v41  ;;  %v2099_v41 = vld [vmem:[#allocation12] sm:$0xff] }
 0x56c   :  { %v2103_v45 = vld [vmem:[#allocation12 + $0x20] sm:$0xff] }
 0x56d   :  { %1746 = vmatmul.mubr.f32.vlgmr.msra.gmra.mrb[10].mxu0 %v1609_v12  ;;  %1817 = vmatmul.mubr.f32.vlgmr.msra.gmra.mrb[10].mxu1 %v1609_v12  ;;  %v2356_v48 = vmul.f32 %v3757_v20, %v1609_v12 }
 0x56e   :  { %3002 = vmatpush1.bf16.msra.mxu0 %v3807_v23  ;;  %3034 = vmatpush1.bf16.msra.mxu1 %v3810_v31 }
 0x56f   :  { %2368 = vadd.xlane.f32.xlu0 %v2356_v48  ;;  %3004 = vmatprep.subr.bf16.mxu0 %v3815_v44  ;;  %v3065_v48 = vpack.c.bf16 %v2103_v45, %v2099_v41  ;;  %v3363_v45 = vld [vmem:[%s4089_s4] ss:$0 sm:$0xff]  ;;  %s3468_s4 = smov [#allocation13]  }
 0x570   :  { %3036 = vmatprep.subr.bf16.mxu1 %v3817_v22  ;;  %1986 = vmatprep.mubr.f32.mxu0 %v3465_v1  ;;  %s2539_s15 = sshll.u32 %s3468_s4, 4  ;;  %s2540_s15 = int_to_ptr.vmem [resolvable:$true] %s2539_s15 }
 0x571   :  { %2057 = vmatprep.mubr.f32.mxu1 %v3465_v1  ;;  %s3430_s16 = scalar_lea.vmem %s2540_s15, 128  ;;  %p3435_p11 = scmp.lt.s32.totalorder %s2540_s15, %s2540_s15 }
 0x572   :  { %3006 = vmatpush1.bf16.msra.mxu0 %v3819_v25  ;;  %3038 = vmatpush1.bf16.msra.mxu1 %v3822_v32  ;;  %p3431_p10 = scmp.ne.s32.totalorder %s2540_s15, %s3430_s16  ;;  %p3436_p12 = scmp.lt.s32.totalorder %s3430_s16, %s3430_s16 }
 0x573   :  { %3008 = vmatprep.subr.bf16.mxu0 %v3827_v43  ;;  %3040 = vmatprep.subr.bf16.mxu1 %v3829_v53 }
 0x574   :  { %p3437_p13 = por %p3436_p12, %p3435_p11 }
 0x576   :  { %3010 = vmatpush1.bf16.msra.mxu0 %v3831_v55  ;;  %3042 = vmatpush1.bf16.msra.mxu1 %v3834_v61  ;;  %p3438_p0 = pnand %p3437_p13, %p3431_p10 }
 0x577   :  { %3012 = vmatprep.subr.bf16.mxu0 %v3882_v40  ;;  %3044 = vmatprep.subr.bf16.mxu1 %v3884_v28 }
 0x57a   :  { %3014 = vmatpush1.bf16.msra.mxu0 %v3886_v29  ;;  %3046 = vmatpush1.bf16.msra.mxu1 %v3889_v39 }
 0x57b   :  { %3016 = vmatprep.subr.bf16.mxu0 %v3894_v57  ;;  %3048 = vmatprep.subr.bf16.mxu1 %v3896_v4 }
 0x57e   :  { %3018 = vmatpush1.bf16.msra.mxu0 %v3898_v7  ;;  %3050 = vmatpush1.bf16.msra.mxu1 %v3901_v17 }
 0x57f   :  { %3020 = vmatprep.subr.bf16.mxu0 %v3905_v35  ;;  %3052 = vmatprep.subr.bf16.mxu1 %v3908_v54 }
 0x582   :  { %3022 = vmatpush1.bf16.msra.mxu0 %v3910_v58  ;;  %3054 = vmatpush1.bf16.msra.mxu1 %v3913_v8 }
 0x583   :  { %3024 = vmatprep.subr.bf16.mxu0 %v3916_v15  ;;  %3056 = vmatprep.subr.bf16.mxu1 %v3918_v24 }
 0x586   :  { %3026 = vmatpush1.bf16.msra.mxu0 %v3921_v37  ;;  %3058 = vmatpush1.bf16.msra.mxu1 %v3925_v33 }
 0x587   :  { %3028 = vmatprep.subr.bf16.mxu0 %v3927_v38  ;;  %3060 = vmatprep.subr.bf16.mxu1 %v3930_v59 }
 0x58a   :  { %3030 = vmatpush1.bf16.msra.mxu0 %v3933_v13  ;;  %3062 = vmatpush1.bf16.msra.mxu1 %v3937_v21 }
 0x58b   :  { %3064 = vmatprep.subr.bf16.mxu0 %v3063_v26 }
 0x640   :  { %v1747_v23 = vpop.f32.mrb[10].mxu0  ;;  %v1818_v31 = vpop.f32.mrb[10].mxu1 }
 0x641   :  { %v3137_v44 = vadd.f32 %v1747_v23, %v3737_v16  ;;  %v1749_v22 = vpop.f32.mrb[11].mxu0  ;;  %v1820_v25 = vpop.f32.mrb[11].mxu1  ;;  %v3153_v10 = vadd.f32 %v1818_v31, %v3748_v42  ;;  %v2101_v23 = vld [vmem:[#allocation12 + $0x10] sm:$0xff] }
 0x642   :  { %v3138_v32 = vadd.f32 %v1749_v22, %v3739_v18  ;;  %v3154_v55 = vadd.f32 %v1820_v25, %v3744_v34  ;;  %v2105_v31 = vld [vmem:[#allocation12 + $0x30] sm:$0xff]  ;;  %v2112_v22 = vld [vmem:[#allocation12 + $0x68] sm:$0xff]  ;;  %v2110_v25 = vld [vmem:[#allocation12 + $0x58] sm:$0xff] }
 0x643   :  { %v2584_v43 = vmul.f32 -1.442695, %v3137_v44  ;;  %v3097_v44 = vpack.c.bf16 %v2105_v31, %v2101_v23 }
 0x644   :  { %v2585_v53 = vmul.f32 -1.442695, %v3138_v32  ;;  %v2586_v61 = vmul.f32 -1.442695, %v3154_v55  ;;  %v2114_v32 = vld [vmem:[#allocation12 + $0x78] sm:$0xff] }
 0x645   :  { %3283 = vpow2.f32 %v2584_v43  ;;  %v2107_v43 = vld [vmem:[#allocation12 + $0x40] sm:$0xff]  ;;  %v3099_v55 = vpack.c.bf16 %v2114_v32, %v2110_v25 }
 0x646   :  { %3285 = vpow2.f32 %v2585_v53  ;;  %v2111_v53 = vld [vmem:[#allocation12 + $0x60] sm:$0xff] }
 0x647   :  { %3287 = vpow2.f32 %v2586_v61  ;;  %v3069_v61 = vpack.c.bf16 %v2111_v53, %v2107_v43 }
 0x648   :  { %3289 = vtanh.f32 %v3153_v10  ;;  %v2109_v10 = vld [vmem:[#allocation12 + $0x50] sm:$0xff] }
 0x64f   :  { %v3284_v62 = vpop.eup %3283 }
 0x650   :  { %v3286_v3 = vpop.eup %3285  ;;  %v1830_v6 = vadd.f32 1.0, %v3284_v62  ;;  %v2113_v62 = vld [vmem:[#allocation12 + $0x70] sm:$0xff] }
 0x651   :  { %v1836_v0 = vadd.f32 1.0, %v3286_v3  ;;  %v3288_v2 = vpop.eup %3287  ;;  %v3101_v3 = vpack.c.bf16 %v2113_v62, %v2109_v10 }
 0x652   :  { %3291 = vrcp.f32 %v1830_v6  ;;  %v3290_v14 = vpop.eup %3289  ;;  %v1843_v5 = vadd.f32 1.0, %v3288_v2  ;;  %v2116_v6 = vld [vmem:[#allocation12 + $0x88] sm:$0xff]  ;;  %v2118_v2 = vld [vmem:[#allocation12 + $0x98] sm:$0xff] }
 0x653   :  { %3293 = vrcp.f32 %v1836_v0  ;;  %v2120_v0 = vld [vmem:[#allocation12 + $0xa8] sm:$0xff] }
 0x654   :  { %3295 = vrcp.f32 %v1843_v5 }
 0x65c   :  { %v3292_v27 = vpop.eup %3291 }
 0x65d   :  { %v3294_v51 = vpop.eup %3293  ;;  %v1847_v36 = vmul.f32 %v3292_v27, %v3290_v14  ;;  %v3071_v14 = vpack.c.bf16 %v2120_v0, %v2116_v6  ;;  %v2122_v27 = vld [vmem:[#allocation12 + $0xb8] sm:$0xff] }
 0x65e   :  { %v1846_v49 = vmul.f32 %v3294_v51, %v3992_v30  ;;  %v3296_v52 = vpop.eup %3295  ;;  %v2106_v30 = vld [vmem:[#allocation12 + $0x38] sm:$0xff]  ;;  %v2115_v51 = vld [vmem:[#allocation12 + $0x80] sm:$0xff]  ;;  %v3103_v5 = vpack.c.bf16 %v2122_v27, %v2118_v2 }
 0x65f   :  { %v3095_v12 = vpack.c.bf16 %v2106_v30, %v2102_v63 }
 0x660   :  { %v4033_v19 = vadd.f32 %v1847_v36, %v1846_v49  ;;  %v2119_v36 = vld [vmem:[#allocation12 + $0xa0] sm:$0xff] }
 0x661   :  { %3096 = vmatprep.subr.bf16.mxu1 %v3095_v12  ;;  %v3073_v49 = vpack.c.bf16 %v2119_v36, %v2115_v51 }
 0x662   :  { %3297 = vtanh.f32 %v4033_v19 }
 0x66c   :  { %v3298_v56 = vpop.eup %3297 }
 0x66d   :  { %v1850_v46 = vmul.f32 %v3298_v56, %v3296_v52  ;;  %v2117_v52 = vld [vmem:[#allocation12 + $0x90] sm:$0xff] }
 0x66e   :  { %v2121_v56 = vld [vmem:[#allocation12 + $0xb0] sm:$0xff] }
 0x66f   :  { %1987 = vmatmul.mubr.f32.vlgmr.msra.gmra.mrb[12].mxu0 %v1850_v46  ;;  %2058 = vmatmul.mubr.f32.vlgmr.msra.gmra.mrb[12].mxu1 %v1850_v46  ;;  %v2357_v47 = vmul.f32 %v3757_v20, %v1850_v46  ;;  %v2108_v20 = vld [vmem:[#allocation12 + $0x48] sm:$0xff]  ;;  %v3105_v46 = vpack.c.bf16 %v2121_v56, %v2117_v52 }
 0x670   :  { %2227 = vmatprep.mubr.f32.mxu0 %v3465_v1  ;;  %2298 = vmatprep.mubr.f32.mxu1 %v3465_v1  ;;  %v3067_v1 = vpack.c.bf16 %v2112_v22, %v2108_v20 }
 0x671   :  { %2370 = vadd.xlane.f32.xlu1 %v2357_v47  ;;  %3066 = vmatpush1.bf16.msra.mxu0 %v3065_v48  ;;  %v2594_v48 = vld [vmem:[#allocation6] ss:$0 sm:$0xff] }
 0x672   :  { %3098 = vmatpush1.bf16.msra.mxu1 %v3097_v44  ;;  %3068 = vmatprep.subr.bf16.mxu0 %v3067_v1 }
 0x673   :  { %3100 = vmatprep.subr.bf16.mxu1 %v3099_v55 }
 0x675   :  { %3070 = vmatpush1.bf16.msra.mxu0 %v3069_v61 }
 0x676   :  { %3102 = vmatpush1.bf16.msra.mxu1 %v3101_v3  ;;  %3072 = vmatprep.subr.bf16.mxu0 %v3071_v14 }
 0x677   :  { %3104 = vmatprep.subr.bf16.mxu1 %v3103_v5  ;;  %v2361_v5 = vpop.xlane.xlu0 %2360 }
 0x679   :  { %3074 = vmatpush1.bf16.msra.mxu0 %v3073_v49 }
 0x67a   :  { %3106 = vmatpush1.bf16.msra.mxu1 %v3105_v46  ;;  %3076 = vmatprep.subr.bf16.mxu0 %v3882_v40  ;;  %v3467_v40 = vmov 0  }
 0x67b   :  { %3108 = vmatprep.subr.bf16.mxu1 %v3884_v28  ;;  %3202 = vset.pattern.permute.xlu0 %v3467_v40  ;;  %v2363_v49 = vpop.xlane.xlu0 %2362 }
 0x67d   :  { %3078 = vmatpush1.bf16.msra.mxu0 %v3886_v29 }
 0x67e   :  { %3110 = vmatpush1.bf16.msra.mxu1 %v3889_v39  ;;  %3080 = vmatprep.subr.bf16.mxu0 %v3894_v57 }
 0x67f   :  { %3112 = vmatprep.subr.bf16.mxu1 %v3896_v4  ;;  %v2369_v52 = vpop.xlane.xlu0 %2368 }
 0x681   :  { %3082 = vmatpush1.bf16.msra.mxu0 %v3898_v7 }
 0x682   :  { %3114 = vmatpush1.bf16.msra.mxu1 %v3901_v17  ;;  %3084 = vmatprep.subr.bf16.mxu0 %v3905_v35 }
 0x683   :  { %3116 = vmatprep.subr.bf16.mxu1 %v3908_v54 }
 0x685   :  { %3086 = vmatpush1.bf16.msra.mxu0 %v3910_v58 }
 0x686   :  { %3118 = vmatpush1.bf16.msra.mxu1 %v3913_v8  ;;  %3088 = vmatprep.subr.bf16.mxu0 %v3916_v15 }
 0x687   :  { %3120 = vmatprep.subr.bf16.mxu1 %v3918_v24 }
 0x689   :  { %3090 = vmatpush1.bf16.msra.mxu0 %v3921_v37 }
 0x68a   :  { %3122 = vmatpush1.bf16.msra.mxu1 %v3925_v33  ;;  %3092 = vmatprep.subr.bf16.mxu0 %v3927_v38 }
 0x68b   :  { %3124 = vmatprep.subr.bf16.mxu1 %v3930_v59 }
 0x68d   :  { %3094 = vmatpush1.bf16.msra.mxu0 %v3933_v13 }
 0x68e   :  { %3126 = vmatpush1.bf16.msra.mxu1 %v3937_v21 }
 0x742   :  { %v1988_v28 = vpop.f32.mrb[12].mxu0  ;;  %v2059_v29 = vpop.f32.mrb[12].mxu1 }
 0x743   :  { %v3139_v39 = vadd.f32 %v1988_v28, %v3737_v16  ;;  %v1990_v57 = vpop.f32.mrb[13].mxu0  ;;  %v2061_v4 = vpop.f32.mrb[13].mxu1  ;;  %v3155_v8 = vadd.f32 %v2059_v29, %v3748_v42 }
 0x744   :  { %v3140_v7 = vadd.f32 %v1990_v57, %v3739_v18  ;;  %v3156_v54 = vadd.f32 %v2061_v4, %v3744_v34  ;;  %v2365_v29 = vpop.xlane.xlu1 %2364 }
 0x745   :  { %v2587_v17 = vmul.f32 -1.442695, %v3139_v39 }
 0x746   :  { %v2588_v35 = vmul.f32 -1.442695, %v3140_v7  ;;  %v2589_v58 = vmul.f32 -1.442695, %v3156_v54 }
 0x747   :  { %3299 = vpow2.f32 %v2587_v17 }
 0x748   :  { %3301 = vpow2.f32 %v2588_v35  ;;  %v2367_v7 = vpop.xlane.xlu1 %2366 }
 0x749   :  { %3303 = vpow2.f32 %v2589_v58 }
 0x74a   :  { %3305 = vtanh.f32 %v3155_v8 }
 0x74c   :  { %v2371_v8 = vpop.xlane.xlu1 %2370 }
 0x751   :  { %v3300_v15 = vpop.eup %3299 }
 0x752   :  { %v3302_v24 = vpop.eup %3301  ;;  %v2071_v37 = vadd.f32 1.0, %v3300_v15 }
 0x753   :  { %v2077_v33 = vadd.f32 1.0, %v3302_v24  ;;  %v3304_v38 = vpop.eup %3303 }
 0x754   :  { %3307 = vrcp.f32 %v2071_v37  ;;  %v3306_v59 = vpop.eup %3305  ;;  %v2084_v50 = vadd.f32 1.0, %v3304_v38 }
 0x755   :  { %3309 = vrcp.f32 %v2077_v33 }
 0x756   :  { %3311 = vrcp.f32 %v2084_v50 }
 0x75e   :  { %v3308_v13 = vpop.eup %3307 }
 0x75f   :  { %v3310_v21 = vpop.eup %3309  ;;  %v2088_v47 = vmul.f32 %v3308_v13, %v3306_v59 }
 0x760   :  { %v2087_v60 = vmul.f32 %v3310_v21, %v4033_v19  ;;  %v3312_v26 = vpop.eup %3311 }
 0x762   :  { %v2089_v63 = vadd.f32 %v2088_v47, %v2087_v60 }
 0x764   :  { %3313 = vtanh.f32 %v2089_v63 }
 0x76e   :  { %v3314_v30 = vpop.eup %3313 }
 0x76f   :  { %v2091_v41 = vmul.f32 %v3314_v30, %v3312_v26 }
 0x771   :  { %2228 = vmatmul.mubr.f32.vlgmr.msra.gmra.mrb[14].mxu0 %v2091_v41  ;;  %2299 = vmatmul.mubr.f32.vlgmr.msra.gmra.mrb[14].mxu1 %v2091_v41  ;;  %v2358_v12 = vmul.f32 %v3363_v45, %v2091_v41 }
 0x773   :  { %2372 = vadd.xlane.f32.xlu0 %v2358_v12 }
 0x789   :  { %2383 = vperm.xlu0 %3202, %v2594_v48   ;;  %v2451_v48 = vand.u32 127, %v91_v9 }
 0x800   :  { %v2373_v56 = vpop.xlane.xlu0 %2372 }
 0x808   :  { %v2384_v46 = vpop.permute.xlu0 %2383 }
 0x809   :  { %v2386_v40 = vadd.f32 %v2384_v46, %v2361_v5  ;;  %v2387_v28 = vadd.f32 %v2384_v46, %v2363_v49  ;;  %v2388_v39 = vadd.f32 %v2384_v46, %v2365_v29  ;;  %v2389_v35 = vadd.f32 %v2384_v46, %v2367_v7 }
 0x80a   :  { %v2390_v54 = vadd.f32 %v2384_v46, %v2369_v52  ;;  %v2391_v15 = vadd.f32 %v2384_v46, %v2371_v8  ;;  %v2392_v24 = vadd.f32 %v2384_v46, %v2373_v56 }
 0x80b   :  { %v2595_v57 = vmul.f32 -1.442695, %v2386_v40  ;;  %v2596_v4 = vmul.f32 -1.442695, %v2387_v28  ;;  %v2597_v17 = vmul.f32 -1.442695, %v2388_v39 }
 0x80c   :  { %v2598_v58 = vmul.f32 -1.442695, %v2389_v35  ;;  %v2599_v37 = vmul.f32 -1.442695, %v2390_v54  ;;  %v2600_v59 = vmul.f32 -1.442695, %v2391_v15 }
 0x80d   :  { %v2601_v13 = vmul.f32 -1.442695, %v2392_v24 }
 0x844   :  { %v2229_v23 = vpop.f32.mrb[14].mxu0  ;;  %v2300_v31 = vpop.f32.mrb[14].mxu1 }
 0x845   :  { %v3141_v19 = vadd.f32 %v2229_v23, %v3737_v16  ;;  %v2231_v44 = vpop.f32.mrb[15].mxu0  ;;  %v2302_v20 = vpop.f32.mrb[15].mxu1  ;;  %v3157_v53 = vadd.f32 %v2300_v31, %v3748_v42 }
 0x846   :  { %v3142_v22 = vadd.f32 %v2231_v44, %v3739_v18  ;;  %v3158_v32 = vadd.f32 %v2302_v20, %v3744_v34  ;;  %v2454_v20 = vsub.s32 %v2451_v48, %v3730_v11 }
 0x847   :  { %v2590_v25 = vmul.f32 -1.442695, %v3141_v19 }
 0x848   :  { %v2591_v1 = vmul.f32 -1.442695, %v3142_v22  ;;  %v2592_v43 = vmul.f32 -1.442695, %v3158_v32 }
 0x849   :  { %3315 = vpow2.f32 %v2590_v25 }
 0x84a   :  { %3317 = vpow2.f32 %v2591_v1 }
 0x84b   :  { %3319 = vpow2.f32 %v2592_v43 }
 0x84c   :  { %3321 = vtanh.f32 %v3157_v53 }
 0x853   :  { %v3316_v55 = vpop.eup %3315 }
 0x854   :  { %v3318_v61 = vpop.eup %3317  ;;  %v2312_v10 = vadd.f32 1.0, %v3316_v55 }
 0x855   :  { %v2318_v62 = vadd.f32 1.0, %v3318_v61  ;;  %v3320_v16 = vpop.eup %3319 }
 0x856   :  { %3323 = vrcp.f32 %v2312_v10  ;;  %v3322_v3 = vpop.eup %3321  ;;  %v2325_v2 = vadd.f32 1.0, %v3320_v16 }
 0x857   :  { %3325 = vrcp.f32 %v2318_v62 }
 0x858   :  { %3327 = vrcp.f32 %v2325_v2 }
 0x860   :  { %v3324_v18 = vpop.eup %3323 }
 0x861   :  { %v3326_v6 = vpop.eup %3325  ;;  %v2329_v0 = vmul.f32 %v3324_v18, %v3322_v3 }
 0x862   :  { %v2328_v14 = vmul.f32 %v3326_v6, %v2089_v63  ;;  %v3328_v34 = vpop.eup %3327 }
 0x864   :  { %v2330_v27 = vadd.f32 %v2329_v0, %v2328_v14 }
 0x866   :  { %3329 = vtanh.f32 %v2330_v27 }
 0x867   :  { %3331 = vpow2.f32 %v2595_v57 }
 0x868   :  { %3333 = vpow2.f32 %v2596_v4 }
 0x869   :  { %3335 = vpow2.f32 %v2597_v17 }
 0x86a   :  { %3337 = vpow2.f32 %v2598_v58 }
 0x86b   :  { %3339 = vpow2.f32 %v2599_v37 }
 0x86c   :  { %3341 = vpow2.f32 %v2600_v59 }
 0x86d   :  { %3343 = vpow2.f32 %v2601_v13 }
 0x870   :  { %v3330_v42 = vpop.eup %3329 }
 0x871   :  { %v2332_v51 = vmul.f32 %v3330_v42, %v3328_v34  ;;  %v3332_v33 = vpop.eup %3331 }
 0x872   :  { %v3334_v38 = vpop.eup %3333  ;;  %v2418_v21 = vadd.f32 1.0, %v3332_v33 }
 0x873   :  { %v2359_v36 = vmul.f32 %v3363_v45, %v2332_v51  ;;  %v3336_v47 = vpop.eup %3335  ;;  %v2419_v50 = vadd.f32 1.0, %v3334_v38 }
 0x874   :  { %v2420_v60 = vadd.f32 1.0, %v3336_v47  ;;  %3345 = vrcp.f32 %v2418_v21  ;;  %v3338_v63 = vpop.eup %3337 }
 0x875   :  { %2374 = vadd.xlane.f32.xlu1 %v2359_v36  ;;  %3347 = vrcp.f32 %v2419_v50  ;;  %v3340_v41 = vpop.eup %3339  ;;  %v2421_v45 = vadd.f32 1.0, %v3338_v63 }
 0x876   :  { %3349 = vrcp.f32 %v2420_v60  ;;  %v3342_v23 = vpop.eup %3341  ;;  %v2422_v31 = vadd.f32 1.0, %v3340_v41 }
 0x877   :  { %v3344_v19 = vpop.eup %3343  ;;  %v2423_v25 = vadd.f32 1.0, %v3342_v23 }
 0x878   :  { %v2424_v32 = vadd.f32 1.0, %v3344_v19 }
 0x87e   :  { %v3346_v44 = vpop.eup %3345 }
 0x87f   :  { %v3348_v22 = vpop.eup %3347  ;;  %v2455_v43 = vrot.slane %v3346_v44, %v2454_v20 }
 0x880   :  { %v3350_v1 = vpop.eup %3349  ;;  %v2459_v53 = vrot.slane %v3348_v22, %v2454_v20 }
 0x881   :  { %v2463_v55 = vrot.slane %v3350_v1, %v2454_v20 }
 0x882   :  { %v2485_v9 = vsel %vm2484_vm4, %v2459_v53, %v2455_v43 }
 0x883   :  { %v2487_v16 = vsel %vm2486_vm5, %v2463_v55, %v2485_v9 }
 0x902   :  { %v2375_v26 = vpop.xlane.xlu1 %2374 }
 0x903   :  { %v2393_v30 = vadd.f32 %v2384_v46, %v2375_v26 }
 0x905   :  { %v2602_v12 = vmul.f32 -1.442695, %v2393_v30 }
 0x907   :  { %3351 = vpow2.f32 %v2602_v12 }
 0x908   :  { %3353 = vrcp.f32 %v2421_v45 }
 0x909   :  { %3355 = vrcp.f32 %v2422_v31 }
 0x90a   :  { %3357 = vrcp.f32 %v2423_v25 }
 0x90b   :  { %3359 = vrcp.f32 %v2424_v32 }
 0x911   :  { %v3352_v61 = vpop.eup %3351 }
 0x912   :  { %v3354_v10 = vpop.eup %3353  ;;  %v2425_v62 = vadd.f32 1.0, %v3352_v61 }
 0x913   :  { %v3356_v11 = vpop.eup %3355  ;;  %v2467_v3 = vrot.slane %v3354_v10, %v2454_v20 }
 0x914   :  { %3361 = vrcp.f32 %v2425_v62  ;;  %v3358_v6 = vpop.eup %3357  ;;  %v2471_v0 = vrot.slane %v3356_v11, %v2454_v20 }
 0x915   :  { %v2489_v18 = vsel %vm2488_vm6, %v2467_v3, %v2487_v16  ;;  %v3360_v14 = vpop.eup %3359  ;;  %v2475_v27 = vrot.slane %v3358_v6, %v2454_v20 }
 0x916   :  { %v2491_v2 = vsel %vm2490_vm7, %v2471_v0, %v2489_v18  ;;  %v2479_v51 = vrot.slane %v3360_v14, %v2454_v20 }
 0x917   :  { %v2493_v34 = vsel %vm2492_vm8, %v2475_v27, %v2491_v2 }
 0x918   :  { %v2495_v5 = vsel %vm2494_vm9, %v2479_v51, %v2493_v34 }
 0x91e   :  { %v3362_v42 = vpop.eup %3361 }
 0x91f   :  { %v2483_v36 = vrot.slane %v3362_v42, %v2454_v20 }
 0x921   :  { %v2497_v49 = vsel %vm2496_vm10, %v2483_v36, %v2495_v5 }
 0x922   :  { %2499 = vxpose.xlu1.b32.start.end [1/1] (short) (narrow) %v2497_v49, 8 }
 0x9a2   :  { %v2515_v52 = vpop.trf.xlu1 }
 0x9a3   :  { %2532 = vst.msk [vmem:[#allocation13] sm:$0xff] %vm2531_vm11, %v2515_v52 }
 0x9a4   :  { %3441 = shalt.err (!%p3438_p0)
}
 0x9a5   :  { %s3442_s19 = scalar_lea.hbm %s4091_s6, 128 }
 0x9a6   :  { %p3443_p1 = scmp.ne.s32.totalorder %s4091_s6, %s3442_s19  ;;  %p3446_p2 = scmp.lt.u32.totalorder %s3442_s19, %s4091_s6 }
 0x9a8   :  { %p3448_p3 = pnand %p3446_p2, %p3443_p1 }
 0x9aa   :  { %3451 = shalt.err (!%p3448_p3)
}
 0x9ab   :  { %2542 = dma.vmem_to_hbm [thread:$0]  %s2540_s15, 128, %s4091_s6, [#allocation9]  }
 0x9ac   :  { %3456 = dma.done.wait [#allocation9], 128  }
 0x9ad   :  { %3457 = vsyncadd [#allocation9], 4294967168 }
 0x9ae   :  { %2546 = vsyncpa [#allocation8], 1 }
 0x9af   :  { %2547 = vsyncpa [#allocation11], 1 }
 0x9b0   :  { %2548 = vsyncpa [#allocation9], 1 }

</bundles_post_ra>
